<compile_context>
chip_gen: v7x
topology: tpu7x:2x2x1
jax: 0.10.0
libtpu: 0.0.40
codegen_flags: <defaults>
</compile_context>

<pallas_src>
import functools

import jax
import jax.numpy as jnp
import numpy as np
from jax import lax
from jax.experimental import pallas as pl
from jax.experimental.pallas import tpu as pltpu


# ----------------------------------------------------------------------------
# Helpers
# ----------------------------------------------------------------------------
def _round_up(n, m):
    return ((n + m - 1) // m) * m


def _pick_row_tile(m_rows, sub, cap=512):
    """Largest divisor of m_rows that is <= cap and a multiple of `sub`."""
    for d in range(min(m_rows, cap), 0, -1):
        if m_rows % d == 0 and d % sub == 0:
            return d
    return m_rows   # full array (always a legal block)


# ----------------------------------------------------------------------------
# Kernel 1: hoisted input projection (one 4H-wide matmul per row tile).
#   gx[m, :] = x_flat[m, :] @ W_ih_stacked + (b_ih + b_hh)
# ----------------------------------------------------------------------------
def _gates_kernel(x_ref, w_ref, b_ref, gx_ref):
    gx_ref[...] = (
        jnp.dot(x_ref[...], w_ref[...], preferred_element_type=jnp.float32)
        + b_ref[...].astype(jnp.float32)
    ).astype(gx_ref.dtype)


def gates_precompute(x_flat, w_stacked, bias, *, out_dtype):
    """x_flat: (M, Din); w_stacked: (Din, 4H); bias: (1, 4H) -> (M, 4H)."""
    M, Din = x_flat.shape
    H4 = w_stacked.shape[1]
    sub = 16 if out_dtype == jnp.bfloat16 else 8
    tm = _pick_row_tile(M, sub, cap=512)          # decoupled from tc*B
    n_m = M // tm
    return pl.pallas_call(
        _gates_kernel,
        out_shape=jax.ShapeDtypeStruct((M, H4), out_dtype),
        grid_spec=pltpu.PrefetchScalarGridSpec(
            num_scalar_prefetch=0,
            grid=(n_m,),
            in_specs=[
                pl.BlockSpec((tm, Din), lambda m: (m, 0)),
                pl.BlockSpec((Din, H4), lambda m: (0, 0)),
                pl.BlockSpec((1, H4), lambda m: (0, 0)),
            ],
            out_specs=pl.BlockSpec((tm, H4), lambda m: (m, 0)),
        ),
        compiler_params=pltpu.CompilerParams(
            dimension_semantics=("parallel",),
            vmem_limit_bytes=48 * 1024 * 1024),
    )(x_flat, w_stacked, bias)


# ----------------------------------------------------------------------------
# Recurrence body: one chunk of `tc` timesteps.
# Gate order (PyTorch): i, f, g, o -- sliced at static lane offsets k*H.
# ----------------------------------------------------------------------------
def _lstm_chunk(gx_ref, w_hh, h0, c0, *, tc, H, cdt, t_valid, t_base,
                hseq_ref, unroll):
    def step(s, carry):
        h, c = carry
        pre = gx_ref[s].astype(jnp.float32) + jnp.dot(
            h.astype(cdt), w_hh, preferred_element_type=jnp.float32)
        i_g = jax.nn.sigmoid(pre[:, 0 * H:1 * H])
        f_g = jax.nn.sigmoid(pre[:, 1 * H:2 * H])
        g_g = jnp.tanh(pre[:, 2 * H:3 * H])
        o_g = jax.nn.sigmoid(pre[:, 3 * H:4 * H])
        c_new = f_g * c + i_g * g_g
        h_new = o_g * jnp.tanh(c_new)
        if t_valid is not None:           # tail masking (T padded to mult of tc)
            valid = (t_base + s) < t_valid
            h_new = jnp.where(valid, h_new, h)
            c_new = jnp.where(valid, c_new, c)
        if hseq_ref is not None:
            hseq_ref[s] = h_new.astype(hseq_ref.dtype)
        return h_new, c_new

    return lax.fori_loop(0, tc, step, (h0, c0), unroll=unroll)


def _lstm_seq_kernel(gx_ref, whh_ref, hseq_ref, h_sc, c_sc,
                     *, tc, H, cdt, t_valid, unroll):
    c_idx = pl.program_id(1)

    @pl.when(c_idx == 0)
    def _():
        h_sc[...] = jnp.zeros_like(h_sc)
        c_sc[...] = jnp.zeros_like(c_sc)

    h, c = _lstm_chunk(gx_ref, whh_ref[...], h_sc[...], c_sc[...],
                       tc=tc, H=H, cdt=cdt, t_valid=t_valid,
                       t_base=c_idx * tc, hseq_ref=hseq_ref, unroll=unroll)
    h_sc[...] = h
    c_sc[...] = c


def _lstm_last_kernel(gx_ref, whh_ref, wfc_ref, bfc_ref, lat_ref, h_sc, c_sc,
                      *, tc, H, cdt, t_valid, unroll):
    c_idx = pl.program_id(1)

    @pl.when(c_idx == 0)
    def _():
        h_sc[...] = jnp.zeros_like(h_sc)
        c_sc[...] = jnp.zeros_like(c_sc)
        lat_ref[...] = jnp.zeros_like(lat_ref)    # safety: never flush garbage

    h, c = _lstm_chunk(gx_ref, whh_ref[...], h_sc[...], c_sc[...],
                       tc=tc, H=H, cdt=cdt, t_valid=t_valid,
                       t_base=c_idx * tc, hseq_ref=None, unroll=unroll)
    h_sc[...] = h
    c_sc[...] = c

    # Fused FC epilogue: latent = hidden[-1] @ W_fc^T + b_fc
    @pl.when(c_idx == pl.num_programs(1) - 1)
    def _():
        lat_ref[...] = (
            jnp.dot(h.astype(cdt), wfc_ref[...],
                    preferred_element_type=jnp.float32)
            + bfc_ref[...].astype(jnp.float32)
        ).astype(lat_ref.dtype)


def lstm_recurrence_seq(gx, whh_t, *, T_pad, B, bb, tc, t_valid, out_dtype):
    """Intermediate layer: returns the hidden sequence (T_pad, B, H)."""
    H4 = whh_t.shape[1]
    H = H4 // 4
    n_c = T_pad // tc
    n_b = B // bb
    unroll = True if H < 512 else 4
    kernel = functools.partial(_lstm_seq_kernel, tc=tc, H=H, cdt=whh_t.dtype,
                               t_valid=t_valid, unroll=unroll)
    return pl.pallas_call(
        kernel,
        out_shape=jax.ShapeDtypeStruct((T_pad, B, H), out_dtype),
        grid_spec=pltpu.PrefetchScalarGridSpec(
            num_scalar_prefetch=0,
            grid=(n_b, n_c),
            in_specs=[
                pl.BlockSpec((tc, bb, H4), lambda b, c: (c, b, 0)),
                pl.BlockSpec((H, H4), lambda b, c: (0, 0)),
            ],
            out_specs=pl.BlockSpec((tc, bb, H), lambda b, c: (c, b, 0)),
            scratch_shapes=[pltpu.VMEM((bb, H), jnp.float32),   # h carry (f32)
                            pltpu.VMEM((bb, H), jnp.float32)],  # c carry (f32)
        ),
        compiler_params=pltpu.CompilerParams(
            dimension_semantics=("parallel", "arbitrary"),
            vmem_limit_bytes=48 * 1024 * 1024),
    )(gx, whh_t)


def lstm_recurrence_last(gx, whh_t, wfc_t, bfc, *, T_pad, B, bb, tc, t_valid):
    """Last layer: no h_seq writeback; fused FC -> (B, latent_dim) f32."""
    H4 = whh_t.shape[1]
    H = H4 // 4
    L = wfc_t.shape[1]
    n_c = T_pad // tc
    n_b = B // bb
    unroll = True if H < 512 else 4
    kernel = functools.partial(_lstm_last_kernel, tc=tc, H=H, cdt=whh_t.dtype,
                               t_valid=t_valid, unroll=unroll)
    return pl.pallas_call(
        kernel,
        out_shape=jax.ShapeDtypeStruct((B, L), jnp.float32),
        grid_spec=pltpu.PrefetchScalarGridSpec(
            num_scalar_prefetch=0,
            grid=(n_b, n_c),
            in_specs=[
                pl.BlockSpec((tc, bb, H4), lambda b, c: (c, b, 0)),
                pl.BlockSpec((H, H4), lambda b, c: (0, 0)),
                pl.BlockSpec((H, L), lambda b, c: (0, 0)),
                pl.BlockSpec((1, L), lambda b, c: (0, 0)),
            ],
            out_specs=pl.BlockSpec((bb, L), lambda b, c: (b, 0)),
            scratch_shapes=[pltpu.VMEM((bb, H), jnp.float32),
                            pltpu.VMEM((bb, H), jnp.float32)],
        ),
        compiler_params=pltpu.CompilerParams(
            dimension_semantics=("parallel", "arbitrary"),
            vmem_limit_bytes=48 * 1024 * 1024),
    )(gx, whh_t, wfc_t, bfc)


# ----------------------------------------------------------------------------
# Weight re-layout (runs ONCE, outside the jitted forward).
# PyTorch layout: wih (4H, Din), whh (4H, H), gate row order i,f,g,o.
# ----------------------------------------------------------------------------
def prepare_encoder_params(params, compute_dtype=jnp.float32):
    lstm_params, (wfc, bfc) = params
    packed = []
    for (wih, whh, bih, bhh) in lstm_params:
        H = whh.shape[1]
        wih_t = jnp.transpose(wih).astype(compute_dtype)   # (Din, 4H) lane-stacked
        whh_t = jnp.transpose(whh).astype(compute_dtype)   # (H,   4H) lane-stacked
        b4 = (bih + bhh).reshape(1, 4 * H).astype(jnp.float32)
        packed.append((wih_t, whh_t, b4))
    wfc_t = jnp.transpose(wfc).astype(compute_dtype)        # (H, L)
    bfc2 = bfc.reshape(1, -1).astype(jnp.float32)
    return (tuple(packed), (wfc_t, bfc2))


# ----------------------------------------------------------------------------
# Encoder forward (batch_first input, like PyTorch).
# ----------------------------------------------------------------------------
@functools.partial(jax.jit, static_argnames=("time_chunk",))
def encoder_forward(x, packed_params, *, time_chunk=32):
    """x: (B, T, input_dim). Returns latent (B, latent_dim) float32."""
    lstm_params, (wfc_t, bfc) = packed_params
    cdt = lstm_params[0][0].dtype                     # matmul operand dtype
    sub = 16 if cdt == jnp.bfloat16 else 8            # sublane pack granularity

    B0, T, _ = x.shape
    B = _round_up(B0, sub)                            # batch padding
    tc = min(time_chunk, T)
    T_pad = _round_up(T, tc)                          # time padding (tail masked)
    t_valid = T if T_pad != T else None               # static; None -> no mask

    # Batch blocking: 2 blocks when batch is big enough (v7x megacore split).
    n_b = 2 if (B >= 2 * sub and B % (2 * sub) == 0) else 1
    bb = B // n_b

    xp = x.astype(cdt)
    if B != B0:
        xp = jnp.pad(xp, ((0, B - B0), (0, 0), (0, 0)))
    if T_pad != T:
        xp = jnp.pad(xp, ((0, 0), (0, T_pad - T), (0, 0)))
    h_seq = jnp.transpose(xp, (1, 0, 2))              # (T_pad, B, Din) time-major

    n_layers = len(lstm_params)
    latent = None
    for li, (wih_t, whh_t, b4) in enumerate(lstm_params):
        H4 = wih_t.shape[1]
        din = wih_t.shape[0]
        x_flat = h_seq.reshape(T_pad * B, din)
        gx = gates_precompute(x_flat, wih_t, b4, out_dtype=cdt)   # (M, 4H)
        gx = gx.reshape(T_pad, B, H4)
        if li < n_layers - 1:
            h_seq = lstm_recurrence_seq(gx, whh_t, T_pad=T_pad, B=B, bb=bb,
                                        tc=tc, t_valid=t_valid, out_dtype=cdt)
        else:
            latent = lstm_recurrence_last(gx, whh_t, wfc_t, bfc, T_pad=T_pad,
                                          B=B, bb=bb, tc=tc, t_valid=t_valid)
    return latent[:B0]


# ----------------------------------------------------------------------------
# Parameter init (matches nn.LSTM / nn.Linear shapes & gate order i,f,g,o).
# ----------------------------------------------------------------------------
def init_encoder_params(key, input_dim, hidden_dim, latent_dim, num_layers):
    lstm = []
    k = 1.0 / np.sqrt(hidden_dim)
    for layer in range(num_layers):
        din = input_dim if layer == 0 else hidden_dim
        key, k1, k2, k3, k4 = jax.random.split(key, 5)
        wih = jax.random.uniform(k1, (4 * hidden_dim, din), jnp.float32, -k, k)
        whh = jax.random.uniform(k2, (4 * hidden_dim, hidden_dim), jnp.float32, -k, k)
        bih = jax.random.uniform(k3, (4 * hidden_dim,), jnp.float32, -k, k)
        bhh = jax.random.uniform(k4, (4 * hidden_dim,), jnp.float32, -k, k)
        lstm.append((wih, whh, bih, bhh))
    key, k5, k6 = jax.random.split(key, 3)
    wfc = jax.random.uniform(k5, (latent_dim, hidden_dim), jnp.float32, -k, k)
    bfc = jax.random.uniform(k6, (latent_dim,), jnp.float32, -k, k)
    return (tuple(lstm), (wfc, bfc))


# ----------------------------------------------------------------------------
# Pure-JAX reference (mirrors PyTorch LSTM + Linear semantics).
# ----------------------------------------------------------------------------
def encoder_reference(x, params):
    lstm_params, (wfc, bfc) = params
    B, T, _ = x.shape
    h_in = x.astype(jnp.float32)
    for (wih, whh, bih, bhh) in lstm_params:
        H = whh.shape[1]
        h = jnp.zeros((B, H), jnp.float32)
        c = jnp.zeros((B, H), jnp.float32)
        outs = []
        for t in range(T):
            gates = h_in[:, t, :] @ wih.T + h @ whh.T + bih + bhh
            i = jax.nn.sigmoid(gates[:, 0 * H:1 * H])
            f = jax.nn.sigmoid(gates[:, 1 * H:2 * H])
            g = jnp.tanh(gates[:, 2 * H:3 * H])
            o = jax.nn.sigmoid(gates[:, 3 * H:4 * H])
            c = f * c + i * g
            h = o * jnp.tanh(c)
            outs.append(h)
        h_in = jnp.stack(outs, axis=1)
    return h_in[:, -1, :] @ wfc.T + bfc


if __name__ == "__main__":
    input_dim, hidden_dim, latent_dim, num_layers = 16, 32, 8, 2

    key = jax.random.PRNGKey(0)
    key, kx1, kx2 = jax.random.split(key, 3)
    params = init_encoder_params(key, input_dim, hidden_dim, latent_dim, num_layers)
    packed_f32 = prepare_encoder_params(params, jnp.float32)

    # Case 1: T divisible by chunk (2 chunks of 4): exercises the h/c carry
    # across the sequential grid and batch padding 2 -> 8.
    x1 = jax.random.normal(kx1, (2, 8, input_dim), jnp.float32)
    out1 = jax.block_until_ready(encoder_forward(x1, packed_f32, time_chunk=4))
    ref1 = encoder_reference(x1, params)
    np.testing.assert_allclose(np.asarray(out1), np.asarray(ref1),
                               rtol=1e-4, atol=1e-5)
    assert out1.shape == (2, latent_dim)

    # Case 2: ragged T=11 with tc=4: exercises time padding + tail masking.
    x2 = jax.random.normal(kx2, (3, 11, input_dim), jnp.float32)
    out2 = jax.block_until_ready(encoder_forward(x2, packed_f32, time_chunk=4))
    ref2 = encoder_reference(x2, params)
    np.testing.assert_allclose(np.asarray(out2), np.asarray(ref2),
                               rtol=1e-4, atol=1e-5)

    # Case 3: bf16 matmul operands (f32 accumulation, f32 h/c carries) -- the
    # MXU-native path for v6e/v7x.  Sanity-check it runs and is finite.
    packed_bf16 = prepare_encoder_params(params, jnp.bfloat16)
    out3 = jax.block_until_ready(encoder_forward(x1, packed_bf16, time_chunk=4))
    assert np.all(np.isfinite(np.asarray(out3, dtype=np.float32)))

    print("KERNEL_OK")
</pallas_src>

<mosaic_0001>
module attributes {stable_mosaic.version = 11 : i64} {
  func.func @_gates_kernel(%arg0: i32, %arg1: memref<64x16xf32, #tpu.memory_space<vmem>>, %arg2: memref<16x128xf32, #tpu.memory_space<vmem>>, %arg3: memref<1x128xf32, #tpu.memory_space<vmem>>, %arg4: memref<64x128xf32, #tpu.memory_space<vmem>>) attributes {dimension_semantics = [#tpu.dimension_semantics<parallel>], iteration_bounds = array<i64: 1>, scalar_prefetch = 0 : i64, scratch_operands = 0 : i64, tpu.core_type = #tpu.core_type<tc>, window_params = [{transform_indices = @transform_0, window_bounds = array<i64: 64, 16>}, {pipeline_mode = #tpu.pipeline_mode<synchronous>, transform_indices = @transform_1, window_bounds = array<i64: 16, 128>}, {pipeline_mode = #tpu.pipeline_mode<synchronous>, transform_indices = @transform_2, window_bounds = array<i64: 1, 128>}, {transform_indices = @transform_3, window_bounds = array<i64: 64, 128>}]} {
    %c0 = arith.constant 0 : index
    %c0_0 = arith.constant 0 : index
    %0 = vector.load %arg1[%c0, %c0_0] : memref<64x16xf32, #tpu.memory_space<vmem>>, vector<64x16xf32>
    %c0_1 = arith.constant 0 : index
    %c0_2 = arith.constant 0 : index
    %1 = vector.load %arg2[%c0_1, %c0_2] : memref<16x128xf32, #tpu.memory_space<vmem>>, vector<16x128xf32>
    %cst = arith.constant dense<0.000000e+00> : vector<64x128xf32>
    %2 = tpu.matmul %0, %1, %cst {dimension_numbers = #tpu.dot_dimension_numbers<[1], [0], [0], [1], [0, 0, 1, 1], [], []>} : vector<64x16xf32>, vector<16x128xf32>, vector<64x128xf32> -> vector<64x128xf32>
    %c0_3 = arith.constant 0 : index
    %c0_4 = arith.constant 0 : index
    %3 = vector.load %arg3[%c0_3, %c0_4] : memref<1x128xf32, #tpu.memory_space<vmem>>, vector<1x128xf32>
    %4 = vector.broadcast %3 : vector<1x128xf32> to vector<64x128xf32>
    %5 = arith.addf %2, %4 : vector<64x128xf32>
    %c0_5 = arith.constant 0 : index
    %c0_6 = arith.constant 0 : index
    %6 = vector.load %arg4[%c0_5, %c0_6] : memref<64x128xf32, #tpu.memory_space<vmem>>, vector<64x128xf32>
    tpu.vector_store %arg4[%c0_5, %c0_6], %5 {strides = array<i32>} : memref<64x128xf32, #tpu.memory_space<vmem>>, vector<64x128xf32>,
    return
  }
  func.func @transform_0(%arg0: i32) -> (i32, i32) {
    %c0_i32 = arith.constant 0 : i32
    %c0_i32_0 = arith.constant 0 : i32
    return %arg0, %c0_i32 : i32, i32
  }
  func.func @transform_1(%arg0: i32) -> (i32, i32) {
    %c0_i32 = arith.constant 0 : i32
    %c0_i32_0 = arith.constant 0 : i32
    %c0_i32_1 = arith.constant 0 : i32
    return %c0_i32, %c0_i32_0 : i32, i32
  }
  func.func @transform_2(%arg0: i32) -> (i32, i32) {
    %c0_i32 = arith.constant 0 : i32
    %c0_i32_0 = arith.constant 0 : i32
    %c0_i32_1 = arith.constant 0 : i32
    return %c0_i32, %c0_i32_0 : i32, i32
  }
  func.func @transform_3(%arg0: i32) -> (i32, i32) {
    %c0_i32 = arith.constant 0 : i32
    %c0_i32_0 = arith.constant 0 : i32
    return %arg0, %c0_i32 : i32, i32
  }
}

module attributes {stable_mosaic.version = 11 : i64} {
  func.func @_lstm_seq_kernel(%arg0: i32, %arg1: i32, %arg2: memref<4x8x128xf32, #tpu.memory_space<vmem>>, %arg3: memref<32x128xf32, #tpu.memory_space<vmem>>, %arg4: memref<4x8x32xf32, #tpu.memory_space<vmem>>, %arg5: memref<8x32xf32, #tpu.memory_space<vmem>>, %arg6: memref<8x32xf32, #tpu.memory_space<vmem>>) attributes {dimension_semantics = [#tpu.dimension_semantics<parallel>, #tpu.dimension_semantics<arbitrary>], iteration_bounds = array<i64: 1, 2>, scalar_prefetch = 0 : i64, scratch_operands = 2 : i64, tpu.core_type = #tpu.core_type<tc>, window_params = [{transform_indices = @transform_0, window_bounds = array<i64: 4, 8, 128>}, {pipeline_mode = #tpu.pipeline_mode<synchronous>, transform_indices = @transform_1, window_bounds = array<i64: 32, 128>}, {transform_indices = @transform_2, window_bounds = array<i64: 4, 8, 32>}]} {
    %c0_i32 = arith.constant 0 : i32
    %0 = arith.cmpi eq, %arg1, %c0_i32 : i32
    %1 = arith.extui %0 : i1 to i32
    %c0_i32_0 = arith.constant 0 : i32
    %2 = arith.cmpi ne, %1, %c0_i32_0 : i32
    scf.if %2 {
      %cst_42 = arith.constant 0.000000e+00 : f32
      %144 = vector.broadcast %cst_42 : f32 to vector<8x32xf32>
      %c0_43 = arith.constant 0 : index
      %c0_44 = arith.constant 0 : index
      %145 = vector.load %arg5[%c0_43, %c0_44] : memref<8x32xf32, #tpu.memory_space<vmem>>, vector<8x32xf32>
      tpu.vector_store %arg5[%c0_43, %c0_44], %144 {strides = array<i32>} : memref<8x32xf32, #tpu.memory_space<vmem>>, vector<8x32xf32>,
      %cst_45 = arith.constant 0.000000e+00 : f32
      %146 = vector.broadcast %cst_45 : f32 to vector<8x32xf32>
      %c0_46 = arith.constant 0 : index
      %c0_47 = arith.constant 0 : index
      %147 = vector.load %arg6[%c0_46, %c0_47] : memref<8x32xf32, #tpu.memory_space<vmem>>, vector<8x32xf32>
      tpu.vector_store %arg6[%c0_46, %c0_47], %146 {strides = array<i32>} : memref<8x32xf32, #tpu.memory_space<vmem>>, vector<8x32xf32>,
    } else {
    }
    %c0 = arith.constant 0 : index
    %c0_1 = arith.constant 0 : index
    %3 = vector.load %arg3[%c0, %c0_1] : memref<32x128xf32, #tpu.memory_space<vmem>>, vector<32x128xf32>
    %c0_2 = arith.constant 0 : index
    %c0_3 = arith.constant 0 : index
    %4 = vector.load %arg5[%c0_2, %c0_3] : memref<8x32xf32, #tpu.memory_space<vmem>>, vector<8x32xf32>
    %c0_4 = arith.constant 0 : index
    %c0_5 = arith.constant 0 : index
    %5 = vector.load %arg6[%c0_4, %c0_5] : memref<8x32xf32, #tpu.memory_space<vmem>>, vector<8x32xf32>
    %c0_i32_6 = arith.constant 0 : i32
    %6 = arith.index_cast %c0_i32_6 : i32 to index
    %c0_7 = arith.constant 0 : index
    %c0_8 = arith.constant 0 : index
    %7 = vector.load %arg2[%6, %c0_7, %c0_8] : memref<4x8x128xf32, #tpu.memory_space<vmem>>, vector<1x8x128xf32>
    %8 = vector.shape_cast %7 : vector<1x8x128xf32> to vector<8x128xf32>
    %cst = arith.constant dense<0.000000e+00> : vector<8x128xf32>
    %9 = tpu.matmul %4, %3, %cst {dimension_numbers = #tpu.dot_dimension_numbers<[1], [0], [0], [1], [0, 0, 1, 1], [], []>} : vector<8x32xf32>, vector<32x128xf32>, vector<8x128xf32> -> vector<8x128xf32>
    %10 = arith.addf %8, %9 : vector<8x128xf32>
    %11 = vector.extract_strided_slice %10 {offsets = [0, 0], sizes = [8, 32], strides = [1, 1]} : vector<8x128xf32> to vector<8x32xf32>
    %12 = arith.negf %11 : vector<8x32xf32>
    %13 = math.exp %12 : vector<8x32xf32>
    %cst_9 = arith.constant 1.000000e+00 : f32
    %14 = vector.broadcast %cst_9 : f32 to vector<8x32xf32>
    %15 = arith.addf %14, %13 : vector<8x32xf32>
    %16 = arith.divf %14, %15 : vector<8x32xf32>
    %17 = vector.extract_strided_slice %10 {offsets = [0, 32], sizes = [8, 32], strides = [1, 1]} : vector<8x128xf32> to vector<8x32xf32>
    %18 = arith.negf %17 : vector<8x32xf32>
    %19 = math.exp %18 : vector<8x32xf32>
    %cst_10 = arith.constant 1.000000e+00 : f32
    %20 = vector.broadcast %cst_10 : f32 to vector<8x32xf32>
    %21 = arith.addf %20, %19 : vector<8x32xf32>
    %22 = arith.divf %20, %21 : vector<8x32xf32>
    %23 = vector.extract_strided_slice %10 {offsets = [0, 64], sizes = [8, 32], strides = [1, 1]} : vector<8x128xf32> to vector<8x32xf32>
    %24 = math.tanh %23 : vector<8x32xf32>
    %25 = vector.extract_strided_slice %10 {offsets = [0, 96], sizes = [8, 32], strides = [1, 1]} : vector<8x128xf32> to vector<8x32xf32>
    %26 = arith.negf %25 : vector<8x32xf32>
    %27 = math.exp %26 : vector<8x32xf32>
    %cst_11 = arith.constant 1.000000e+00 : f32
    %28 = vector.broadcast %cst_11 : f32 to vector<8x32xf32>
    %29 = arith.addf %28, %27 : vector<8x32xf32>
    %30 = arith.divf %28, %29 : vector<8x32xf32>
    %31 = arith.mulf %22, %5 : vector<8x32xf32>
    %32 = arith.mulf %16, %24 : vector<8x32xf32>
    %33 = arith.addf %31, %32 : vector<8x32xf32>
    %34 = math.tanh %33 : vector<8x32xf32>
    %35 = arith.mulf %30, %34 : vector<8x32xf32>
    %36 = arith.index_cast %c0_i32_6 : i32 to index
    %c0_12 = arith.constant 0 : index
    %c0_13 = arith.constant 0 : index
    %37 = vector.load %arg4[%36, %c0_12, %c0_13] : memref<4x8x32xf32, #tpu.memory_space<vmem>>, vector<1x8x32xf32>
    %38 = vector.shape_cast %37 : vector<1x8x32xf32> to vector<8x32xf32>
    %39 = vector.shape_cast %35 : vector<8x32xf32> to vector<1x8x32xf32>
    tpu.vector_store %arg4[%36, %c0_12, %c0_13], %39 {strides = array<i32>} : memref<4x8x32xf32, #tpu.memory_space<vmem>>, vector<1x8x32xf32>,
    %c1_i32 = arith.constant 1 : i32
    %40 = arith.index_cast %c1_i32 : i32 to index
    %c0_14 = arith.constant 0 : index
    %c0_15 = arith.constant 0 : index
    %41 = vector.load %arg2[%40, %c0_14, %c0_15] : memref<4x8x128xf32, #tpu.memory_space<vmem>>, vector<1x8x128xf32>
    %42 = vector.shape_cast %41 : vector<1x8x128xf32> to vector<8x128xf32>
    %cst_16 = arith.constant dense<0.000000e+00> : vector<8x128xf32>
    %43 = tpu.matmul %35, %3, %cst_16 {dimension_numbers = #tpu.dot_dimension_numbers<[1], [0], [0], [1], [0, 0, 1, 1], [], []>} : vector<8x32xf32>, vector<32x128xf32>, vector<8x128xf32> -> vector<8x128xf32>
    %44 = arith.addf %42, %43 : vector<8x128xf32>
    %45 = vector.extract_strided_slice %44 {offsets = [0, 0], sizes = [8, 32], strides = [1, 1]} : vector<8x128xf32> to vector<8x32xf32>
    %46 = arith.negf %45 : vector<8x32xf32>
    %47 = math.exp %46 : vector<8x32xf32>
    %cst_17 = arith.constant 1.000000e+00 : f32
    %48 = vector.broadcast %cst_17 : f32 to vector<8x32xf32>
    %49 = arith.addf %48, %47 : vector<8x32xf32>
    %50 = arith.divf %48, %49 : vector<8x32xf32>
    %51 = vector.extract_strided_slice %44 {offsets = [0, 32], sizes = [8, 32], strides = [1, 1]} : vector<8x128xf32> to vector<8x32xf32>
    %52 = arith.negf %51 : vector<8x32xf32>
    %53 = math.exp %52 : vector<8x32xf32>
    %cst_18 = arith.constant 1.000000e+00 : f32
    %54 = vector.broadcast %cst_18 : f32 to vector<8x32xf32>
    %55 = arith.addf %54, %53 : vector<8x32xf32>
    %56 = arith.divf %54, %55 : vector<8x32xf32>
    %57 = vector.extract_strided_slice %44 {offsets = [0, 64], sizes = [8, 32], strides = [1, 1]} : vector<8x128xf32> to vector<8x32xf32>
    %58 = math.tanh %57 : vector<8x32xf32>
    %59 = vector.extract_strided_slice %44 {offsets = [0, 96], sizes = [8, 32], strides = [1, 1]} : vector<8x128xf32> to vector<8x32xf32>
    %60 = arith.negf %59 : vector<8x32xf32>
    %61 = math.exp %60 : vector<8x32xf32>
    %cst_19 = arith.constant 1.000000e+00 : f32
    %62 = vector.broadcast %cst_19 : f32 to vector<8x32xf32>
    %63 = arith.addf %62, %61 : vector<8x32xf32>
    %64 = arith.divf %62, %63 : vector<8x32xf32>
    %65 = arith.mulf %56, %33 : vector<8x32xf32>
    %66 = arith.mulf %50, %58 : vector<8x32xf32>
    %67 = arith.addf %65, %66 : vector<8x32xf32>
    %68 = math.tanh %67 : vector<8x32xf32>
    %69 = arith.mulf %64, %68 : vector<8x32xf32>
    %70 = arith.index_cast %c1_i32 : i32 to index
    %c0_20 = arith.constant 0 : index
    %c0_21 = arith.constant 0 : index
    %71 = vector.load %arg4[%70, %c0_20, %c0_21] : memref<4x8x32xf32, #tpu.memory_space<vmem>>, vector<1x8x32xf32>
    %72 = vector.shape_cast %71 : vector<1x8x32xf32> to vector<8x32xf32>
    %73 = vector.shape_cast %69 : vector<8x32xf32> to vector<1x8x32xf32>
    tpu.vector_store %arg4[%70, %c0_20, %c0_21], %73 {strides = array<i32>} : memref<4x8x32xf32, #tpu.memory_space<vmem>>, vector<1x8x32xf32>,
    %c2_i32 = arith.constant 2 : i32
    %74 = arith.index_cast %c2_i32 : i32 to index
    %c0_22 = arith.constant 0 : index
    %c0_23 = arith.constant 0 : index
    %75 = vector.load %arg2[%74, %c0_22, %c0_23] : memref<4x8x128xf32, #tpu.memory_space<vmem>>, vector<1x8x128xf32>
    %76 = vector.shape_cast %75 : vector<1x8x128xf32> to vector<8x128xf32>
    %cst_24 = arith.constant dense<0.000000e+00> : vector<8x128xf32>
    %77 = tpu.matmul %69, %3, %cst_24 {dimension_numbers = #tpu.dot_dimension_numbers<[1], [0], [0], [1], [0, 0, 1, 1], [], []>} : vector<8x32xf32>, vector<32x128xf32>, vector<8x128xf32> -> vector<8x128xf32>
    %78 = arith.addf %76, %77 : vector<8x128xf32>
    %79 = vector.extract_strided_slice %78 {offsets = [0, 0], sizes = [8, 32], strides = [1, 1]} : vector<8x128xf32> to vector<8x32xf32>
    %80 = arith.negf %79 : vector<8x32xf32>
    %81 = math.exp %80 : vector<8x32xf32>
    %cst_25 = arith.constant 1.000000e+00 : f32
    %82 = vector.broadcast %cst_25 : f32 to vector<8x32xf32>
    %83 = arith.addf %82, %81 : vector<8x32xf32>
    %84 = arith.divf %82, %83 : vector<8x32xf32>
    %85 = vector.extract_strided_slice %78 {offsets = [0, 32], sizes = [8, 32], strides = [1, 1]} : vector<8x128xf32> to vector<8x32xf32>
    %86 = arith.negf %85 : vector<8x32xf32>
    %87 = math.exp %86 : vector<8x32xf32>
    %cst_26 = arith.constant 1.000000e+00 : f32
    %88 = vector.broadcast %cst_26 : f32 to vector<8x32xf32>
    %89 = arith.addf %88, %87 : vector<8x32xf32>
    %90 = arith.divf %88, %89 : vector<8x32xf32>
    %91 = vector.extract_strided_slice %78 {offsets = [0, 64], sizes = [8, 32], strides = [1, 1]} : vector<8x128xf32> to vector<8x32xf32>
    %92 = math.tanh %91 : vector<8x32xf32>
    %93 = vector.extract_strided_slice %78 {offsets = [0, 96], sizes = [8, 32], strides = [1, 1]} : vector<8x128xf32> to vector<8x32xf32>
    %94 = arith.negf %93 : vector<8x32xf32>
    %95 = math.exp %94 : vector<8x32xf32>
    %cst_27 = arith.constant 1.000000e+00 : f32
    %96 = vector.broadcast %cst_27 : f32 to vector<8x32xf32>
    %97 = arith.addf %96, %95 : vector<8x32xf32>
    %98 = arith.divf %96, %97 : vector<8x32xf32>
    %99 = arith.mulf %90, %67 : vector<8x32xf32>
    %100 = arith.mulf %84, %92 : vector<8x32xf32>
    %101 = arith.addf %99, %100 : vector<8x32xf32>
    %102 = math.tanh %101 : vector<8x32xf32>
    %103 = arith.mulf %98, %102 : vector<8x32xf32>
    %104 = arith.index_cast %c2_i32 : i32 to index
    %c0_28 = arith.constant 0 : index
    %c0_29 = arith.constant 0 : index
    %105 = vector.load %arg4[%104, %c0_28, %c0_29] : memref<4x8x32xf32, #tpu.memory_space<vmem>>, vector<1x8x32xf32>
    %106 = vector.shape_cast %105 : vector<1x8x32xf32> to vector<8x32xf32>
    %107 = vector.shape_cast %103 : vector<8x32xf32> to vector<1x8x32xf32>
    tpu.vector_store %arg4[%104, %c0_28, %c0_29], %107 {strides = array<i32>} : memref<4x8x32xf32, #tpu.memory_space<vmem>>, vector<1x8x32xf32>,
    %c3_i32 = arith.constant 3 : i32
    %108 = arith.index_cast %c3_i32 : i32 to index
    %c0_30 = arith.constant 0 : index
    %c0_31 = arith.constant 0 : index
    %109 = vector.load %arg2[%108, %c0_30, %c0_31] : memref<4x8x128xf32, #tpu.memory_space<vmem>>, vector<1x8x128xf32>
    %110 = vector.shape_cast %109 : vector<1x8x128xf32> to vector<8x128xf32>
    %cst_32 = arith.constant dense<0.000000e+00> : vector<8x128xf32>
    %111 = tpu.matmul %103, %3, %cst_32 {dimension_numbers = #tpu.dot_dimension_numbers<[1], [0], [0], [1], [0, 0, 1, 1], [], []>} : vector<8x32xf32>, vector<32x128xf32>, vector<8x128xf32> -> vector<8x128xf32>
    %112 = arith.addf %110, %111 : vector<8x128xf32>
    %113 = vector.extract_strided_slice %112 {offsets = [0, 0], sizes = [8, 32], strides = [1, 1]} : vector<8x128xf32> to vector<8x32xf32>
    %114 = arith.negf %113 : vector<8x32xf32>
    %115 = math.exp %114 : vector<8x32xf32>
    %cst_33 = arith.constant 1.000000e+00 : f32
    %116 = vector.broadcast %cst_33 : f32 to vector<8x32xf32>
    %117 = arith.addf %116, %115 : vector<8x32xf32>
    %118 = arith.divf %116, %117 : vector<8x32xf32>
    %119 = vector.extract_strided_slice %112 {offsets = [0, 32], sizes = [8, 32], strides = [1, 1]} : vector<8x128xf32> to vector<8x32xf32>
    %120 = arith.negf %119 : vector<8x32xf32>
    %121 = math.exp %120 : vector<8x32xf32>
    %cst_34 = arith.constant 1.000000e+00 : f32
    %122 = vector.broadcast %cst_34 : f32 to vector<8x32xf32>
    %123 = arith.addf %122, %121 : vector<8x32xf32>
    %124 = arith.divf %122, %123 : vector<8x32xf32>
    %125 = vector.extract_strided_slice %112 {offsets = [0, 64], sizes = [8, 32], strides = [1, 1]} : vector<8x128xf32> to vector<8x32xf32>
    %126 = math.tanh %125 : vector<8x32xf32>
    %127 = vector.extract_strided_slice %112 {offsets = [0, 96], sizes = [8, 32], strides = [1, 1]} : vector<8x128xf32> to vector<8x32xf32>
    %128 = arith.negf %127 : vector<8x32xf32>
    %129 = math.exp %128 : vector<8x32xf32>
    %cst_35 = arith.constant 1.000000e+00 : f32
    %130 = vector.broadcast %cst_35 : f32 to vector<8x32xf32>
    %131 = arith.addf %130, %129 : vector<8x32xf32>
    %132 = arith.divf %130, %131 : vector<8x32xf32>
    %133 = arith.mulf %124, %101 : vector<8x32xf32>
    %134 = arith.mulf %118, %126 : vector<8x32xf32>
    %135 = arith.addf %133, %134 : vector<8x32xf32>
    %136 = math.tanh %135 : vector<8x32xf32>
    %137 = arith.mulf %132, %136 : vector<8x32xf32>
    %138 = arith.index_cast %c3_i32 : i32 to index
    %c0_36 = arith.constant 0 : index
    %c0_37 = arith.constant 0 : index
    %139 = vector.load %arg4[%138, %c0_36, %c0_37] : memref<4x8x32xf32, #tpu.memory_space<vmem>>, vector<1x8x32xf32>
    %140 = vector.shape_cast %139 : vector<1x8x32xf32> to vector<8x32xf32>
    %141 = vector.shape_cast %137 : vector<8x32xf32> to vector<1x8x32xf32>
    tpu.vector_store %arg4[%138, %c0_36, %c0_37], %141 {strides = array<i32>} : memref<4x8x32xf32, #tpu.memory_space<vmem>>, vector<1x8x32xf32>,
    %c4_i32 = arith.constant 4 : i32
    %c0_38 = arith.constant 0 : index
    %c0_39 = arith.constant 0 : index
    %142 = vector.load %arg5[%c0_38, %c0_39] : memref<8x32xf32, #tpu.memory_space<vmem>>, vector<8x32xf32>
    tpu.vector_store %arg5[%c0_38, %c0_39], %137 {strides = array<i32>} : memref<8x32xf32, #tpu.memory_space<vmem>>, vector<8x32xf32>,
    %c0_40 = arith.constant 0 : index
    %c0_41 = arith.constant 0 : index
    %143 = vector.load %arg6[%c0_40, %c0_41] : memref<8x32xf32, #tpu.memory_space<vmem>>, vector<8x32xf32>
    tpu.vector_store %arg6[%c0_40, %c0_41], %135 {strides = array<i32>} : memref<8x32xf32, #tpu.memory_space<vmem>>, vector<8x32xf32>,
    return
  }
  func.func @transform_0(%arg0: i32, %arg1: i32) -> (i32, i32, i32) {
    %c0_i32 = arith.constant 0 : i32
    %c0_i32_0 = arith.constant 0 : i32
    return %arg1, %arg0, %c0_i32 : i32, i32, i32
  }
  func.func @transform_1(%arg0: i32, %arg1: i32) -> (i32, i32) {
    %c0_i32 = arith.constant 0 : i32
    %c0_i32_0 = arith.constant 0 : i32
    %c0_i32_1 = arith.constant 0 : i32
    return %c0_i32, %c0_i32_0 : i32, i32
  }
  func.func @transform_2(%arg0: i32, %arg1: i32) -> (i32, i32, i32) {
    %c0_i32 = arith.constant 0 : i32
    %c0_i32_0 = arith.constant 0 : i32
    return %arg1, %arg0, %c0_i32 : i32, i32, i32
  }
}

module attributes {stable_mosaic.version = 11 : i64} {
  func.func @_gates_kernel(%arg0: i32, %arg1: memref<64x32xf32, #tpu.memory_space<vmem>>, %arg2: memref<32x128xf32, #tpu.memory_space<vmem>>, %arg3: memref<1x128xf32, #tpu.memory_space<vmem>>, %arg4: memref<64x128xf32, #tpu.memory_space<vmem>>) attributes {dimension_semantics = [#tpu.dimension_semantics<parallel>], iteration_bounds = array<i64: 1>, scalar_prefetch = 0 : i64, scratch_operands = 0 : i64, tpu.core_type = #tpu.core_type<tc>, window_params = [{transform_indices = @transform_0, window_bounds = array<i64: 64, 32>}, {pipeline_mode = #tpu.pipeline_mode<synchronous>, transform_indices = @transform_1, window_bounds = array<i64: 32, 128>}, {pipeline_mode = #tpu.pipeline_mode<synchronous>, transform_indices = @transform_2, window_bounds = array<i64: 1, 128>}, {transform_indices = @transform_3, window_bounds = array<i64: 64, 128>}]} {
    %c0 = arith.constant 0 : index
    %c0_0 = arith.constant 0 : index
    %0 = vector.load %arg1[%c0, %c0_0] : memref<64x32xf32, #tpu.memory_space<vmem>>, vector<64x32xf32>
    %c0_1 = arith.constant 0 : index
    %c0_2 = arith.constant 0 : index
    %1 = vector.load %arg2[%c0_1, %c0_2] : memref<32x128xf32, #tpu.memory_space<vmem>>, vector<32x128xf32>
    %cst = arith.constant dense<0.000000e+00> : vector<64x128xf32>
    %2 = tpu.matmul %0, %1, %cst {dimension_numbers = #tpu.dot_dimension_numbers<[1], [0], [0], [1], [0, 0, 1, 1], [], []>} : vector<64x32xf32>, vector<32x128xf32>, vector<64x128xf32> -> vector<64x128xf32>
    %c0_3 = arith.constant 0 : index
    %c0_4 = arith.constant 0 : index
    %3 = vector.load %arg3[%c0_3, %c0_4] : memref<1x128xf32, #tpu.memory_space<vmem>>, vector<1x128xf32>
    %4 = vector.broadcast %3 : vector<1x128xf32> to vector<64x128xf32>
    %5 = arith.addf %2, %4 : vector<64x128xf32>
    %c0_5 = arith.constant 0 : index
    %c0_6 = arith.constant 0 : index
    %6 = vector.load %arg4[%c0_5, %c0_6] : memref<64x128xf32, #tpu.memory_space<vmem>>, vector<64x128xf32>
    tpu.vector_store %arg4[%c0_5, %c0_6], %5 {strides = array<i32>} : memref<64x128xf32, #tpu.memory_space<vmem>>, vector<64x128xf32>,
    return
  }
  func.func @transform_0(%arg0: i32) -> (i32, i32) {
    %c0_i32 = arith.constant 0 : i32
    %c0_i32_0 = arith.constant 0 : i32
    return %arg0, %c0_i32 : i32, i32
  }
  func.func @transform_1(%arg0: i32) -> (i32, i32) {
    %c0_i32 = arith.constant 0 : i32
    %c0_i32_0 = arith.constant 0 : i32
    %c0_i32_1 = arith.constant 0 : i32
    return %c0_i32, %c0_i32_0 : i32, i32
  }
  func.func @transform_2(%arg0: i32) -> (i32, i32) {
    %c0_i32 = arith.constant 0 : i32
    %c0_i32_0 = arith.constant 0 : i32
    %c0_i32_1 = arith.constant 0 : i32
    return %c0_i32, %c0_i32_0 : i32, i32
  }
  func.func @transform_3(%arg0: i32) -> (i32, i32) {
    %c0_i32 = arith.constant 0 : i32
    %c0_i32_0 = arith.constant 0 : i32
    return %arg0, %c0_i32 : i32, i32
  }
}

module attributes {stable_mosaic.version = 11 : i64} {
  func.func @_lstm_last_kernel(%arg0: i32, %arg1: i32, %arg2: memref<4x8x128xf32, #tpu.memory_space<vmem>>, %arg3: memref<32x128xf32, #tpu.memory_space<vmem>>, %arg4: memref<32x8xf32, #tpu.memory_space<vmem>>, %arg5: memref<1x8xf32, #tpu.memory_space<vmem>>, %arg6: memref<8x8xf32, #tpu.memory_space<vmem>>, %arg7: memref<8x32xf32, #tpu.memory_space<vmem>>, %arg8: memref<8x32xf32, #tpu.memory_space<vmem>>) attributes {dimension_semantics = [#tpu.dimension_semantics<parallel>, #tpu.dimension_semantics<arbitrary>], iteration_bounds = array<i64: 1, 2>, scalar_prefetch = 0 : i64, scratch_operands = 2 : i64, tpu.core_type = #tpu.core_type<tc>, window_params = [{transform_indices = @transform_0, window_bounds = array<i64: 4, 8, 128>}, {pipeline_mode = #tpu.pipeline_mode<synchronous>, transform_indices = @transform_1, window_bounds = array<i64: 32, 128>}, {pipeline_mode = #tpu.pipeline_mode<synchronous>, transform_indices = @transform_2, window_bounds = array<i64: 32, 8>}, {pipeline_mode = #tpu.pipeline_mode<synchronous>, transform_indices = @transform_3, window_bounds = array<i64: 1, 8>}, {transform_indices = @transform_4, window_bounds = array<i64: 8, 8>}]} {
    %c0_i32 = arith.constant 0 : i32
    %0 = arith.cmpi eq, %arg1, %c0_i32 : i32
    %1 = arith.extui %0 : i1 to i32
    %c0_i32_0 = arith.constant 0 : i32
    %2 = arith.cmpi ne, %1, %c0_i32_0 : i32
    scf.if %2 {
      %cst_36 = arith.constant 0.000000e+00 : f32
      %131 = vector.broadcast %cst_36 : f32 to vector<8x32xf32>
      %c0_37 = arith.constant 0 : index
      %c0_38 = arith.constant 0 : index
      %132 = vector.load %arg7[%c0_37, %c0_38] : memref<8x32xf32, #tpu.memory_space<vmem>>, vector<8x32xf32>
      tpu.vector_store %arg7[%c0_37, %c0_38], %131 {strides = array<i32>} : memref<8x32xf32, #tpu.memory_space<vmem>>, vector<8x32xf32>,
      %cst_39 = arith.constant 0.000000e+00 : f32
      %133 = vector.broadcast %cst_39 : f32 to vector<8x32xf32>
      %c0_40 = arith.constant 0 : index
      %c0_41 = arith.constant 0 : index
      %134 = vector.load %arg8[%c0_40, %c0_41] : memref<8x32xf32, #tpu.memory_space<vmem>>, vector<8x32xf32>
      tpu.vector_store %arg8[%c0_40, %c0_41], %133 {strides = array<i32>} : memref<8x32xf32, #tpu.memory_space<vmem>>, vector<8x32xf32>,
      %cst_42 = arith.constant 0.000000e+00 : f32
      %135 = vector.broadcast %cst_42 : f32 to vector<8x8xf32>
      %c0_43 = arith.constant 0 : index
      %c0_44 = arith.constant 0 : index
      %136 = vector.load %arg6[%c0_43, %c0_44] : memref<8x8xf32, #tpu.memory_space<vmem>>, vector<8x8xf32>
      tpu.vector_store %arg6[%c0_43, %c0_44], %135 {strides = array<i32>} : memref<8x8xf32, #tpu.memory_space<vmem>>, vector<8x8xf32>,
    } else {
    }
    %c0 = arith.constant 0 : index
    %c0_1 = arith.constant 0 : index
    %3 = vector.load %arg3[%c0, %c0_1] : memref<32x128xf32, #tpu.memory_space<vmem>>, vector<32x128xf32>
    %c0_2 = arith.constant 0 : index
    %c0_3 = arith.constant 0 : index
    %4 = vector.load %arg7[%c0_2, %c0_3] : memref<8x32xf32, #tpu.memory_space<vmem>>, vector<8x32xf32>
    %c0_4 = arith.constant 0 : index
    %c0_5 = arith.constant 0 : index
    %5 = vector.load %arg8[%c0_4, %c0_5] : memref<8x32xf32, #tpu.memory_space<vmem>>, vector<8x32xf32>
    %c0_i32_6 = arith.constant 0 : i32
    %6 = arith.index_cast %c0_i32_6 : i32 to index
    %c0_7 = arith.constant 0 : index
    %c0_8 = arith.constant 0 : index
    %7 = vector.load %arg2[%6, %c0_7, %c0_8] : memref<4x8x128xf32, #tpu.memory_space<vmem>>, vector<1x8x128xf32>
    %8 = vector.shape_cast %7 : vector<1x8x128xf32> to vector<8x128xf32>
    %cst = arith.constant dense<0.000000e+00> : vector<8x128xf32>
    %9 = tpu.matmul %4, %3, %cst {dimension_numbers = #tpu.dot_dimension_numbers<[1], [0], [0], [1], [0, 0, 1, 1], [], []>} : vector<8x32xf32>, vector<32x128xf32>, vector<8x128xf32> -> vector<8x128xf32>
    %10 = arith.addf %8, %9 : vector<8x128xf32>
    %11 = vector.extract_strided_slice %10 {offsets = [0, 0], sizes = [8, 32], strides = [1, 1]} : vector<8x128xf32> to vector<8x32xf32>
    %12 = arith.negf %11 : vector<8x32xf32>
    %13 = math.exp %12 : vector<8x32xf32>
    %cst_9 = arith.constant 1.000000e+00 : f32
    %14 = vector.broadcast %cst_9 : f32 to vector<8x32xf32>
    %15 = arith.addf %14, %13 : vector<8x32xf32>
    %16 = arith.divf %14, %15 : vector<8x32xf32>
    %17 = vector.extract_strided_slice %10 {offsets = [0, 32], sizes = [8, 32], strides = [1, 1]} : vector<8x128xf32> to vector<8x32xf32>
    %18 = arith.negf %17 : vector<8x32xf32>
    %19 = math.exp %18 : vector<8x32xf32>
    %cst_10 = arith.constant 1.000000e+00 : f32
    %20 = vector.broadcast %cst_10 : f32 to vector<8x32xf32>
    %21 = arith.addf %20, %19 : vector<8x32xf32>
    %22 = arith.divf %20, %21 : vector<8x32xf32>
    %23 = vector.extract_strided_slice %10 {offsets = [0, 64], sizes = [8, 32], strides = [1, 1]} : vector<8x128xf32> to vector<8x32xf32>
    %24 = math.tanh %23 : vector<8x32xf32>
    %25 = vector.extract_strided_slice %10 {offsets = [0, 96], sizes = [8, 32], strides = [1, 1]} : vector<8x128xf32> to vector<8x32xf32>
    %26 = arith.negf %25 : vector<8x32xf32>
    %27 = math.exp %26 : vector<8x32xf32>
    %cst_11 = arith.constant 1.000000e+00 : f32
    %28 = vector.broadcast %cst_11 : f32 to vector<8x32xf32>
    %29 = arith.addf %28, %27 : vector<8x32xf32>
    %30 = arith.divf %28, %29 : vector<8x32xf32>
    %31 = arith.mulf %22, %5 : vector<8x32xf32>
    %32 = arith.mulf %16, %24 : vector<8x32xf32>
    %33 = arith.addf %31, %32 : vector<8x32xf32>
    %34 = math.tanh %33 : vector<8x32xf32>
    %35 = arith.mulf %30, %34 : vector<8x32xf32>
    %c1_i32 = arith.constant 1 : i32
    %36 = arith.index_cast %c1_i32 : i32 to index
    %c0_12 = arith.constant 0 : index
    %c0_13 = arith.constant 0 : index
    %37 = vector.load %arg2[%36, %c0_12, %c0_13] : memref<4x8x128xf32, #tpu.memory_space<vmem>>, vector<1x8x128xf32>
    %38 = vector.shape_cast %37 : vector<1x8x128xf32> to vector<8x128xf32>
    %cst_14 = arith.constant dense<0.000000e+00> : vector<8x128xf32>
    %39 = tpu.matmul %35, %3, %cst_14 {dimension_numbers = #tpu.dot_dimension_numbers<[1], [0], [0], [1], [0, 0, 1, 1], [], []>} : vector<8x32xf32>, vector<32x128xf32>, vector<8x128xf32> -> vector<8x128xf32>
    %40 = arith.addf %38, %39 : vector<8x128xf32>
    %41 = vector.extract_strided_slice %40 {offsets = [0, 0], sizes = [8, 32], strides = [1, 1]} : vector<8x128xf32> to vector<8x32xf32>
    %42 = arith.negf %41 : vector<8x32xf32>
    %43 = math.exp %42 : vector<8x32xf32>
    %cst_15 = arith.constant 1.000000e+00 : f32
    %44 = vector.broadcast %cst_15 : f32 to vector<8x32xf32>
    %45 = arith.addf %44, %43 : vector<8x32xf32>
    %46 = arith.divf %44, %45 : vector<8x32xf32>
    %47 = vector.extract_strided_slice %40 {offsets = [0, 32], sizes = [8, 32], strides = [1, 1]} : vector<8x128xf32> to vector<8x32xf32>
    %48 = arith.negf %47 : vector<8x32xf32>
    %49 = math.exp %48 : vector<8x32xf32>
    %cst_16 = arith.constant 1.000000e+00 : f32
    %50 = vector.broadcast %cst_16 : f32 to vector<8x32xf32>
    %51 = arith.addf %50, %49 : vector<8x32xf32>
    %52 = arith.divf %50, %51 : vector<8x32xf32>
    %53 = vector.extract_strided_slice %40 {offsets = [0, 64], sizes = [8, 32], strides = [1, 1]} : vector<8x128xf32> to vector<8x32xf32>
    %54 = math.tanh %53 : vector<8x32xf32>
    %55 = vector.extract_strided_slice %40 {offsets = [0, 96], sizes = [8, 32], strides = [1, 1]} : vector<8x128xf32> to vector<8x32xf32>
    %56 = arith.negf %55 : vector<8x32xf32>
    %57 = math.exp %56 : vector<8x32xf32>
    %cst_17 = arith.constant 1.000000e+00 : f32
    %58 = vector.broadcast %cst_17 : f32 to vector<8x32xf32>
    %59 = arith.addf %58, %57 : vector<8x32xf32>
    %60 = arith.divf %58, %59 : vector<8x32xf32>
    %61 = arith.mulf %52, %33 : vector<8x32xf32>
    %62 = arith.mulf %46, %54 : vector<8x32xf32>
    %63 = arith.addf %61, %62 : vector<8x32xf32>
    %64 = math.tanh %63 : vector<8x32xf32>
    %65 = arith.mulf %60, %64 : vector<8x32xf32>
    %c2_i32 = arith.constant 2 : i32
    %66 = arith.index_cast %c2_i32 : i32 to index
    %c0_18 = arith.constant 0 : index
    %c0_19 = arith.constant 0 : index
    %67 = vector.load %arg2[%66, %c0_18, %c0_19] : memref<4x8x128xf32, #tpu.memory_space<vmem>>, vector<1x8x128xf32>
    %68 = vector.shape_cast %67 : vector<1x8x128xf32> to vector<8x128xf32>
    %cst_20 = arith.constant dense<0.000000e+00> : vector<8x128xf32>
    %69 = tpu.matmul %65, %3, %cst_20 {dimension_numbers = #tpu.dot_dimension_numbers<[1], [0], [0], [1], [0, 0, 1, 1], [], []>} : vector<8x32xf32>, vector<32x128xf32>, vector<8x128xf32> -> vector<8x128xf32>
    %70 = arith.addf %68, %69 : vector<8x128xf32>
    %71 = vector.extract_strided_slice %70 {offsets = [0, 0], sizes = [8, 32], strides = [1, 1]} : vector<8x128xf32> to vector<8x32xf32>
    %72 = arith.negf %71 : vector<8x32xf32>
    %73 = math.exp %72 : vector<8x32xf32>
    %cst_21 = arith.constant 1.000000e+00 : f32
    %74 = vector.broadcast %cst_21 : f32 to vector<8x32xf32>
    %75 = arith.addf %74, %73 : vector<8x32xf32>
    %76 = arith.divf %74, %75 : vector<8x32xf32>
    %77 = vector.extract_strided_slice %70 {offsets = [0, 32], sizes = [8, 32], strides = [1, 1]} : vector<8x128xf32> to vector<8x32xf32>
    %78 = arith.negf %77 : vector<8x32xf32>
    %79 = math.exp %78 : vector<8x32xf32>
    %cst_22 = arith.constant 1.000000e+00 : f32
    %80 = vector.broadcast %cst_22 : f32 to vector<8x32xf32>
    %81 = arith.addf %80, %79 : vector<8x32xf32>
    %82 = arith.divf %80, %81 : vector<8x32xf32>
    %83 = vector.extract_strided_slice %70 {offsets = [0, 64], sizes = [8, 32], strides = [1, 1]} : vector<8x128xf32> to vector<8x32xf32>
    %84 = math.tanh %83 : vector<8x32xf32>
    %85 = vector.extract_strided_slice %70 {offsets = [0, 96], sizes = [8, 32], strides = [1, 1]} : vector<8x128xf32> to vector<8x32xf32>
    %86 = arith.negf %85 : vector<8x32xf32>
    %87 = math.exp %86 : vector<8x32xf32>
    %cst_23 = arith.constant 1.000000e+00 : f32
    %88 = vector.broadcast %cst_23 : f32 to vector<8x32xf32>
    %89 = arith.addf %88, %87 : vector<8x32xf32>
    %90 = arith.divf %88, %89 : vector<8x32xf32>
    %91 = arith.mulf %82, %63 : vector<8x32xf32>
    %92 = arith.mulf %76, %84 : vector<8x32xf32>
    %93 = arith.addf %91, %92 : vector<8x32xf32>
    %94 = math.tanh %93 : vector<8x32xf32>
    %95 = arith.mulf %90, %94 : vector<8x32xf32>
    %c3_i32 = arith.constant 3 : i32
    %96 = arith.index_cast %c3_i32 : i32 to index
    %c0_24 = arith.constant 0 : index
    %c0_25 = arith.constant 0 : index
    %97 = vector.load %arg2[%96, %c0_24, %c0_25] : memref<4x8x128xf32, #tpu.memory_space<vmem>>, vector<1x8x128xf32>
    %98 = vector.shape_cast %97 : vector<1x8x128xf32> to vector<8x128xf32>
    %cst_26 = arith.constant dense<0.000000e+00> : vector<8x128xf32>
    %99 = tpu.matmul %95, %3, %cst_26 {dimension_numbers = #tpu.dot_dimension_numbers<[1], [0], [0], [1], [0, 0, 1, 1], [], []>} : vector<8x32xf32>, vector<32x128xf32>, vector<8x128xf32> -> vector<8x128xf32>
    %100 = arith.addf %98, %99 : vector<8x128xf32>
    %101 = vector.extract_strided_slice %100 {offsets = [0, 0], sizes = [8, 32], strides = [1, 1]} : vector<8x128xf32> to vector<8x32xf32>
    %102 = arith.negf %101 : vector<8x32xf32>
    %103 = math.exp %102 : vector<8x32xf32>
    %cst_27 = arith.constant 1.000000e+00 : f32
    %104 = vector.broadcast %cst_27 : f32 to vector<8x32xf32>
    %105 = arith.addf %104, %103 : vector<8x32xf32>
    %106 = arith.divf %104, %105 : vector<8x32xf32>
    %107 = vector.extract_strided_slice %100 {offsets = [0, 32], sizes = [8, 32], strides = [1, 1]} : vector<8x128xf32> to vector<8x32xf32>
    %108 = arith.negf %107 : vector<8x32xf32>
    %109 = math.exp %108 : vector<8x32xf32>
    %cst_28 = arith.constant 1.000000e+00 : f32
    %110 = vector.broadcast %cst_28 : f32 to vector<8x32xf32>
    %111 = arith.addf %110, %109 : vector<8x32xf32>
    %112 = arith.divf %110, %111 : vector<8x32xf32>
    %113 = vector.extract_strided_slice %100 {offsets = [0, 64], sizes = [8, 32], strides = [1, 1]} : vector<8x128xf32> to vector<8x32xf32>
    %114 = math.tanh %113 : vector<8x32xf32>
    %115 = vector.extract_strided_slice %100 {offsets = [0, 96], sizes = [8, 32], strides = [1, 1]} : vector<8x128xf32> to vector<8x32xf32>
    %116 = arith.negf %115 : vector<8x32xf32>
    %117 = math.exp %116 : vector<8x32xf32>
    %cst_29 = arith.constant 1.000000e+00 : f32
    %118 = vector.broadcast %cst_29 : f32 to vector<8x32xf32>
    %119 = arith.addf %118, %117 : vector<8x32xf32>
    %120 = arith.divf %118, %119 : vector<8x32xf32>
    %121 = arith.mulf %112, %93 : vector<8x32xf32>
    %122 = arith.mulf %106, %114 : vector<8x32xf32>
    %123 = arith.addf %121, %122 : vector<8x32xf32>
    %124 = math.tanh %123 : vector<8x32xf32>
    %125 = arith.mulf %120, %124 : vector<8x32xf32>
    %c4_i32 = arith.constant 4 : i32
    %c0_30 = arith.constant 0 : index
    %c0_31 = arith.constant 0 : index
    %126 = vector.load %arg7[%c0_30, %c0_31] : memref<8x32xf32, #tpu.memory_space<vmem>>, vector<8x32xf32>
    tpu.vector_store %arg7[%c0_30, %c0_31], %125 {strides = array<i32>} : memref<8x32xf32, #tpu.memory_space<vmem>>, vector<8x32xf32>,
    %c0_32 = arith.constant 0 : index
    %c0_33 = arith.constant 0 : index
    %127 = vector.load %arg8[%c0_32, %c0_33] : memref<8x32xf32, #tpu.memory_space<vmem>>, vector<8x32xf32>
    tpu.vector_store %arg8[%c0_32, %c0_33], %123 {strides = array<i32>} : memref<8x32xf32, #tpu.memory_space<vmem>>, vector<8x32xf32>,
    %c1_i32_34 = arith.constant 1 : i32
    %128 = arith.cmpi eq, %arg1, %c1_i32_34 : i32
    %129 = arith.extui %128 : i1 to i32
    %c0_i32_35 = arith.constant 0 : i32
    %130 = arith.cmpi ne, %129, %c0_i32_35 : i32
    scf.if %130 {
      %c0_36 = arith.constant 0 : index
      %c0_37 = arith.constant 0 : index
      %131 = vector.load %arg4[%c0_36, %c0_37] : memref<32x8xf32, #tpu.memory_space<vmem>>, vector<32x8xf32>
      %cst_38 = arith.constant dense<0.000000e+00> : vector<8x8xf32>
      %132 = tpu.matmul %125, %131, %cst_38 {dimension_numbers = #tpu.dot_dimension_numbers<[1], [0], [0], [1], [0, 0, 1, 1], [], []>} : vector<8x32xf32>, vector<32x8xf32>, vector<8x8xf32> -> vector<8x8xf32>
      %c0_39 = arith.constant 0 : index
      %c0_40 = arith.constant 0 : index
      %133 = vector.load %arg5[%c0_39, %c0_40] : memref<1x8xf32, #tpu.memory_space<vmem>>, vector<1x8xf32>
      %134 = vector.broadcast %133 : vector<1x8xf32> to vector<8x8xf32>
      %135 = arith.addf %132, %134 : vector<8x8xf32>
      %c0_41 = arith.constant 0 : index
      %c0_42 = arith.constant 0 : index
      %136 = vector.load %arg6[%c0_41, %c0_42] : memref<8x8xf32, #tpu.memory_space<vmem>>, vector<8x8xf32>
      tpu.vector_store %arg6[%c0_41, %c0_42], %135 {strides = array<i32>} : memref<8x8xf32, #tpu.memory_space<vmem>>, vector<8x8xf32>,
    } else {
    }
    return
  }
  func.func @transform_0(%arg0: i32, %arg1: i32) -> (i32, i32, i32) {
    %c0_i32 = arith.constant 0 : i32
    %c0_i32_0 = arith.constant 0 : i32
    return %arg1, %arg0, %c0_i32 : i32, i32, i32
  }
  func.func @transform_1(%arg0: i32, %arg1: i32) -> (i32, i32) {
    %c0_i32 = arith.constant 0 : i32
    %c0_i32_0 = arith.constant 0 : i32
    %c0_i32_1 = arith.constant 0 : i32
    return %c0_i32, %c0_i32_0 : i32, i32
  }
  func.func @transform_2(%arg0: i32, %arg1: i32) -> (i32, i32) {
    %c0_i32 = arith.constant 0 : i32
    %c0_i32_0 = arith.constant 0 : i32
    %c0_i32_1 = arith.constant 0 : i32
    return %c0_i32, %c0_i32_0 : i32, i32
  }
  func.func @transform_3(%arg0: i32, %arg1: i32) -> (i32, i32) {
    %c0_i32 = arith.constant 0 : i32
    %c0_i32_0 = arith.constant 0 : i32
    %c0_i32_1 = arith.constant 0 : i32
    return %c0_i32, %c0_i32_0 : i32, i32
  }
  func.func @transform_4(%arg0: i32, %arg1: i32) -> (i32, i32) {
    %c0_i32 = arith.constant 0 : i32
    %c0_i32_0 = arith.constant 0 : i32
    return %arg0, %c0_i32 : i32, i32
  }
}

</mosaic_0001>

<bundles_post_ra>
// kernel: encoder_forward.4
= control target key start
LH: loop header
LB: loop body
LE: loop exit
PB: predicated region body
PF: predicated region fallthrough
CT: control target
= control target key end

     0   :  { %vm31_vm0 = vcmask 130048   ;;  %s299_s1 = inlined_call_operand.vmem [shape: f32[16,128], index: 1, kind: input, shape index: {}]   ;;  %s300_s0 = inlined_call_operand.vmem [shape: f32[64,16], index: 0, kind: input, shape index: {}]   ;;  %s301_s2 = inlined_call_operand.vmem [shape: f32[1,128], index: 2, kind: input, shape index: {}]   ;;  %s302_s3 = inlined_call_operand.vmem [shape: f32[64,128], index: 3, kind: output, shape index: {}]  }
   0x1   :  { %v22_v0 = vld [vmem:[%s299_s1] sm:$0xff]  ;;  %v23_v1 = vld [vmem:[%s299_s1 + $0x8] sm:$0xff]  ;;  %v16_v7 = vld [vmem:[%s300_s0 + $0x10] sm:$0xff] }
   0x2   :  { %v14_v2 = vld [vmem:[%s300_s0] sm:$0xff]  ;;  %v208_v3 = vpack.c.bf16 %v23_v1, %v22_v0  ;;  %v15_v5 = vld [vmem:[%s300_s0 + $0x8] sm:$0xff]  ;;  %v20_v8 = vld [vmem:[%s300_s0 + $0x30] sm:$0xff] }
   0x3   :  { %196 = vmatprep.mubr.msk.f32.mxu0 %vm31_vm0, %v14_v2  ;;  %v18_v4 = vld [vmem:[%s300_s0 + $0x20] sm:$0xff]  ;;  %v19_v6 = vld [vmem:[%s300_s0 + $0x28] sm:$0xff]  ;;  %v17_v9 = vld [vmem:[%s300_s0 + $0x18] sm:$0xff] }
   0x4   :  { %202 = vmatprep.mubr.msk.f32.mxu1 %vm31_vm0, %v18_v4  ;;  %209 = vmatprep.subr.bf16.mxu0 %v208_v3  ;;  %v21_v10 = vld [vmem:[%s300_s0 + $0x38] sm:$0xff]  ;;  %v173_v11 = vld [vmem:[%s301_s2] ss:$0 sm:$0xff] }
   0x5   :  { %212 = vmatprep.subr.bf16.mxu1 %v208_v3  ;;  %211 = vmatpush3.bf16.msra.mxu0 %v208_v3 }
   0x6   :  { %213 = vmatpush3.bf16.msra.mxu1 %v208_v3 }
   0x8   :  { %197 = vmatmul.mubr.msk.f32.vlgmr.msra.gmra.mrb[0].mxu0 %vm31_vm0, %v15_v5 }
   0x9   :  { %203 = vmatmul.mubr.msk.f32.vlgmr.msra.gmra.mrb[0].mxu1 %vm31_vm0, %v19_v6  ;;  %199 = vmatprep.mubr.msk.f32.mxu0 %vm31_vm0, %v16_v7 }
   0xa   :  { %205 = vmatprep.mubr.msk.f32.mxu1 %vm31_vm0, %v20_v8 }
   0xc   :  { %200 = vmatmul.mubr.msk.f32.gmra.mrb[2].mxu0 %vm31_vm0, %v17_v9 }
   0xd   :  { %206 = vmatmul.mubr.msk.f32.gmra.mrb[2].mxu1 %vm31_vm0, %v21_v10 }
  0xdb   :  { %v198_v12 = vpop.f32.mrb[0].mxu0 }
  0xdc   :  { %v204_v13 = vpop.f32.mrb[0].mxu1  ;;  %v128_v14 = vadd.f32 %v198_v12, %v173_v11  ;;  %v122_v16 = vpop.f32.mrb[1].mxu0 }
  0xdd   :  { %v148_v15 = vadd.f32 %v204_v13, %v173_v11  ;;  %v142_v17 = vpop.f32.mrb[1].mxu1  ;;  %v123_v18 = vadd.f32 %v173_v11, %v122_v16 }
  0xde   :  { %v143_v19 = vadd.f32 %v173_v11, %v142_v17  ;;  %162 = vst [vmem:[%s302_s3 + $0x8] sm:$0xff] %v128_v14 }
  0xdf   :  { %166 = vst [vmem:[%s302_s3 + $0x28] sm:$0xff] %v148_v15  ;;  %161 = vst [vmem:[%s302_s3] sm:$0xff] %v123_v18  ;;  %v201_v20 = vpop.f32.mrb[2].mxu0 }
  0xe0   :  { %165 = vst [vmem:[%s302_s3 + $0x20] sm:$0xff] %v143_v19  ;;  %v207_v21 = vpop.f32.mrb[2].mxu1  ;;  %v138_v22 = vadd.f32 %v201_v20, %v173_v11  ;;  %v132_v24 = vpop.f32.mrb[3].mxu0 }
  0xe1   :  { %v158_v23 = vadd.f32 %v207_v21, %v173_v11  ;;  %v152_v25 = vpop.f32.mrb[3].mxu1  ;;  %v133_v26 = vadd.f32 %v173_v11, %v132_v24 }
  0xe2   :  { %v153_v27 = vadd.f32 %v173_v11, %v152_v25  ;;  %164 = vst [vmem:[%s302_s3 + $0x18] sm:$0xff] %v138_v22 }
  0xe3   :  { %168 = vst [vmem:[%s302_s3 + $0x38] sm:$0xff] %v158_v23  ;;  %163 = vst [vmem:[%s302_s3 + $0x10] sm:$0xff] %v133_v26 }
  0xe4   :  { %167 = vst [vmem:[%s302_s3 + $0x30] sm:$0xff] %v153_v27 }

// kernel: encoder_forward.5
= control target key start
LH: loop header
LB: loop body
LE: loop exit
PB: predicated region body
PF: predicated region fallthrough
CT: control target
= control target key end

     0   :  { %s922_s9 = smov 0   ;;  %s924_s10 = smov 0   ;;  %s1010_s0 = inlined_call_operand.vmem [shape: f32[8,8,128], index: 0, kind: input, shape index: {}]   ;;  %s1011_s1 = inlined_call_operand.vmem [shape: f32[32,128], index: 1, kind: input, shape index: {}]   ;;  %s1012_s2 = inlined_call_operand.vmem [shape: f32[8,8,32], index: 2, kind: output, shape index: {}]  }
   0x1   :  { %s926_s11 = smov 0  }
   0x2 LB: > { %s21_s12 = sadd.s32 1, %s894_s10  ;;  %p703_p0 = scmp.ge.s32.totalorder %s898_s11, 1  ;;  %s898_s11 = sphi %s926_s11, %s12_s11   ;;  %s894_s10 = sphi %s924_s10, %s1014_s10   ;;  %s890_s9 = sphi %s922_s9, %s1013_s9  }
   0x3   : > { %p22_p1 = scmp.ge.s32.totalorder %s21_s12, 2  ;;  %p132_p2 = scmp.lt.s32.totalorder %s898_s11, 3 }
   0x5   : > { %s1016_s12 = smov (%p22_p1, %s21_s12), 0  ;;  %p133_p3 = pnand %p703_p0, %p132_p2 }
   0x6   : > { %s704_s13 = sshll.u32 (!%p133_p3), %s890_s9, 2  ;;  %p708_p5 = scmp.ne.s32.totalorder (!%p133_p3), %s890_s9, 0 }
   0x7   : > { %136 = sbr.rel (%p133_p3) target bundleno = 2840 (0xb18), region = 28  ;;  %p161_p4 = scmp.lt.s32.totalorder (!%p133_p3), %s704_s13, 7 }
   0xe   : > { %s1018_s13 = smov (!%p161_p4, %s704_s13), 7  ;;  %181 = sbr.rel (%p708_p5) target bundleno = 21 (0x15), region = 32 }
   0xf   : > { %s705_s14 = sshll.u32 %s1018_s13, 3  ;;  %vm182_vm0 = vcmask (!%p708_p5), 261120   ;;  %v900_v0 = vmov (!%p708_p5), 0.0  }
  0x10   : > { %s943_s17 = scalar_lea.vmem %s1010_s0, %s705_s14  ;;  %s948_s20 = scalar_lea.vmem %s1012_s2, %s705_s14  ;;  %183 = vst.msk [vmem:[#allocation2] sm:$0xff] (!%p708_p5), %vm182_vm0, %v900_v0  ;;  %184 = vst.msk [vmem:[#allocation3] sm:$0xff] (!%p708_p5), %vm182_vm0, %v900_v0 }
  0x15 PF: > { %v185_v1 = vld [vmem:[%s1011_s1] sm:$0xff]  ;;  %v186_v2 = vld [vmem:[%s1011_s1 + $0x8] sm:$0xff]  ;;  %v187_v3 = vld [vmem:[%s1011_s1 + $0x10] sm:$0xff]  ;;  %v901_v4 = vmov 0.0|0.0   ;;  %vm902_vm1 = vmmov 0   ;;  %v903_v7 = vmov 0.0  }
  0x16   : > { %789 = vmatprep.subr.bf16.mxu0 %v901_v4  ;;  %v790_v5 = vpack.c.bf16 %v186_v2, %v185_v1  ;;  %v188_v6 = vld [vmem:[%s1011_s1 + $0x18] sm:$0xff]  ;;  %753 = vmatprep.mubr.msk.f32.mxu0 %vm902_vm1, %v903_v7  ;;  %vm192_vm2 = vcmask 261120   ;;  %v191_v10 = vld [vmem:[%s943_s17] sm:$0xff]  ;;  %s904_s29 = smov 64   ;;  %s905_s30 = smov 32   ;;  %v711_v30 = vld [vmem:[%s943_s17 + $0x8] sm:$0xff] }
  0x17   : > { %795 = vmatprep.subr.bf16.mxu1 %v901_v4  ;;  %764 = vmatprep.mubr.msk.f32.mxu1 %vm902_vm1, %v903_v7  ;;  %v793_v8 = vpack.c.bf16 %v188_v6, %v187_v3  ;;  %v189_v9 = vld [vmem:[#allocation2] sm:$0xff]  ;;  %v190_v15 = vld [vmem:[#allocation3] sm:$0xff]  ;;  %v715_v48 = vld [vmem:[%s943_s17 + $0x10] sm:$0xff]  ;;  %s906_s3 = smov 96  }
  0x18   : > { %791 = vmatpush3.bf16.msra.mxu0 %v790_v5  ;;  %797 = vmatpush3.bf16.msra.mxu1 %v790_v5  ;;  %v719_v2 = vld [vmem:[%s943_s17 + $0x18] sm:$0xff] }
  0x19   : > { %792 = vmatprep.subr.bf16.mxu0 %v901_v4  ;;  %798 = vmatprep.subr.bf16.mxu1 %v901_v4 }
  0x1c   : > { %794 = vmatpush3.bf16.msra.mxu0 %v793_v8  ;;  %800 = vmatpush3.bf16.msra.mxu1 %v793_v8 }
  0x1d   : > { %801 = vmatprep.subr.bf16.mxu0 %v901_v4  ;;  %807 = vmatprep.subr.bf16.mxu1 %v901_v4 }
  0x1f   : > { %754 = vmatmul.mubr.msk.f32.vlgmr.msra.gmra.mrb[0].mxu0 %vm192_vm2, %v189_v9 }
  0x20   : > { %803 = vmatpush3.bf16.msra.mxu0 %v790_v5  ;;  %775 = vmatprep.mubr.msk.f32.mxu0 %vm902_vm1, %v903_v7 }
  0x21   : > { %804 = vmatprep.subr.bf16.mxu0 %v901_v4 }
  0x24   : > { %806 = vmatpush3.bf16.msra.mxu0 %v793_v8 }
  0xf2   : > { %v262_v11 = vpop.f32.mrb[0].mxu0 }
  0xf3   : > { %v266_v12 = vadd.f32 %v262_v11, %v191_v10  ;;  %v755_v13 = vpop.f32.mrb[1].mxu0 }
  0xf5   : > { %844 = vtanh.f32 %v266_v12  ;;  %v710_v16 = vmul.f32 -1.442695, %v266_v12 }
  0xf7   : > { %846 = vpow2.f32 %v710_v16 }
  0xff   : > { %v845_v14 = vpop.eup %844 }
 0x100   : > { %280 = vrot.lane.b32.xlu0 %v845_v14, %s904_s29 }
 0x101   : > { %v847_v17 = vpop.eup %846 }
 0x102   : > { %v270_v18 = vadd.f32 1.0, %v847_v17 }
 0x104   : > { %275 = vrot.lane.b32.xlu0 %v190_v15, %s905_s30  ;;  %848 = vrcp.f32 %v270_v18 }
 0x10e   : > { %v849_v19 = vpop.eup %848 }
 0x172   : > { %v281_v20 = vpop.permute.xlu0 %280 }
 0x173   : > { %v283_v21 = vmul.f32 %v849_v19, %v281_v20 }
 0x175   : > { %285 = vrot.lane.b32.xlu1 %v283_v21, %s905_s30 }
 0x176   : > { %v276_v22 = vpop.permute.xlu0 %275 }
 0x177   : > { %v278_v23 = vmul.f32 %v849_v19, %v276_v22 }
 0x1e7   : > { %v286_v24 = vpop.permute.xlu1 %285 }
 0x1e8   : > { %v288_v25 = vadd.f32 %v286_v24, %v278_v23 }
 0x1ea   : > { %850 = vtanh.f32 %v288_v25 }
 0x1f4   : > { %v851_v26 = vpop.eup %850 }
 0x1f5   : > { %291 = vrot.lane.b32.xlu1 %v851_v26, %s904_s29 }
 0x267   : > { %v292_v27 = vpop.permute.xlu1 %291 }
 0x268   : > { %v294_v28 = vmul.f32 %v849_v19, %v292_v27 }
 0x26a   : > { %296 = vrot.lane.b32.xlu0 %v294_v28, %s905_s30 }
 0x2dc   : > { %v297_v29 = vpop.permute.xlu0 %296 }
 0x2dd   : > { %299 = vst.msk [vmem:[%s948_s20] sm:$0xff] %vm192_vm2, %v297_v29  ;;  %765 = vmatmul.mubr.msk.f32.vlgmr.msra.gmra.mrb[0].mxu1 %vm192_vm2, %v297_v29 }
 0x2de   : > { %809 = vmatpush3.bf16.msra.mxu1 %v790_v5  ;;  %786 = vmatprep.mubr.msk.f32.mxu1 %vm902_vm1, %v903_v7 }
 0x2df   : > { %810 = vmatprep.subr.bf16.mxu1 %v901_v4 }
 0x2e2   : > { %812 = vmatpush3.bf16.msra.mxu1 %v793_v8 }
 0x3b0   : > { %v370_v31 = vpop.f32.mrb[0].mxu1 }
 0x3b1   : > { %v374_v32 = vadd.f32 %v711_v30, %v370_v31  ;;  %v766_v33 = vpop.f32.mrb[1].mxu1 }
 0x3b3   : > { %852 = vtanh.f32 %v374_v32  ;;  %v713_v35 = vmul.f32 -1.442695, %v374_v32 }
 0x3b5   : > { %854 = vpow2.f32 %v713_v35 }
 0x3bd   : > { %v853_v34 = vpop.eup %852 }
 0x3be   : > { %384 = vrot.lane.b32.xlu1 %v853_v34, %s904_s29 }
 0x3bf   : > { %v855_v36 = vpop.eup %854 }
 0x3c0   : > { %v378_v37 = vadd.f32 1.0, %v855_v36 }
 0x3c2   : > { %856 = vrcp.f32 %v378_v37 }
 0x3cc   : > { %v857_v38 = vpop.eup %856 }
 0x3cd   : > { %v382_v41 = vmul.f32 %v857_v38, %v288_v25 }
 0x430   : > { %v385_v39 = vpop.permute.xlu1 %384 }
 0x431   : > { %v387_v40 = vmul.f32 %v857_v38, %v385_v39 }
 0x433   : > { %389 = vrot.lane.b32.xlu0 %v387_v40, %s905_s30 }
 0x4a5   : > { %v390_v42 = vpop.permute.xlu0 %389 }
 0x4a6   : > { %v392_v43 = vadd.f32 %v390_v42, %v382_v41 }
 0x4a8   : > { %858 = vtanh.f32 %v392_v43 }
 0x4b2   : > { %v859_v44 = vpop.eup %858 }
 0x4b3   : > { %395 = vrot.lane.b32.xlu1 %v859_v44, %s904_s29 }
 0x525   : > { %v396_v45 = vpop.permute.xlu1 %395 }
 0x526   : > { %v398_v46 = vmul.f32 %v857_v38, %v396_v45 }
 0x528   : > { %400 = vrot.lane.b32.xlu0 %v398_v46, %s905_s30 }
 0x59a   : > { %v401_v47 = vpop.permute.xlu0 %400 }
 0x59b   : > { %714 = vst.msk [vmem:[%s948_s20 + $0x8] sm:$0xff] %vm192_vm2, %v401_v47  ;;  %776 = vmatmul.mubr.msk.f32.vlgmr.msra.gmra.mrb[2].mxu0 %vm192_vm2, %v401_v47 }
 0x66e   : > { %v475_v49 = vpop.f32.mrb[2].mxu0 }
 0x66f   : > { %v479_v50 = vadd.f32 %v715_v48, %v475_v49  ;;  %v777_v51 = vpop.f32.mrb[3].mxu0 }
 0x671   : > { %860 = vtanh.f32 %v479_v50  ;;  %v717_v53 = vmul.f32 -1.442695, %v479_v50 }
 0x673   : > { %862 = vpow2.f32 %v717_v53 }
 0x67b   : > { %v861_v52 = vpop.eup %860 }
 0x67c   : > { %489 = vrot.lane.b32.xlu1 %v861_v52, %s904_s29 }
 0x67d   : > { %v863_v54 = vpop.eup %862 }
 0x67e   : > { %v483_v55 = vadd.f32 1.0, %v863_v54 }
 0x680   : > { %864 = vrcp.f32 %v483_v55 }
 0x68a   : > { %v865_v56 = vpop.eup %864 }
 0x68b   : > { %v487_v59 = vmul.f32 %v865_v56, %v392_v43 }
 0x6ee   : > { %v490_v57 = vpop.permute.xlu1 %489 }
 0x6ef   : > { %v492_v58 = vmul.f32 %v865_v56, %v490_v57 }
 0x6f1   : > { %494 = vrot.lane.b32.xlu0 %v492_v58, %s905_s30 }
 0x763   : > { %v495_v60 = vpop.permute.xlu0 %494 }
 0x764   : > { %v497_v61 = vadd.f32 %v495_v60, %v487_v59 }
 0x766   : > { %866 = vtanh.f32 %v497_v61 }
 0x770   : > { %v867_v62 = vpop.eup %866 }
 0x771   : > { %500 = vrot.lane.b32.xlu1 %v867_v62, %s904_s29 }
 0x7e3   : > { %v501_v63 = vpop.permute.xlu1 %500 }
 0x7e4   : > { %v503_v0 = vmul.f32 %v865_v56, %v501_v63 }
 0x7e6   : > { %505 = vrot.lane.b32.xlu0 %v503_v0, %s905_s30 }
 0x858   : > { %v506_v1 = vpop.permute.xlu0 %505 }
 0x859   : > { %718 = vst.msk [vmem:[%s948_s20 + $0x10] sm:$0xff] %vm192_vm2, %v506_v1  ;;  %787 = vmatmul.mubr.msk.f32.vlgmr.msra.gmra.mrb[2].mxu1 %vm192_vm2, %v506_v1 }
 0x92c   : > { %v580_v3 = vpop.f32.mrb[2].mxu1 }
 0x92d   : > { %v584_v4 = vadd.f32 %v719_v2, %v580_v3  ;;  %v788_v5 = vpop.f32.mrb[3].mxu1 }
 0x92f   : > { %868 = vtanh.f32 %v584_v4  ;;  %v721_v7 = vmul.f32 -1.442695, %v584_v4 }
 0x931   : > { %870 = vpow2.f32 %v721_v7 }
 0x939   : > { %v869_v6 = vpop.eup %868 }
 0x93a   : > { %594 = vrot.lane.b32.xlu1 %v869_v6, %s904_s29 }
 0x93b   : > { %v871_v8 = vpop.eup %870 }
 0x93c   : > { %v588_v9 = vadd.f32 1.0, %v871_v8 }
 0x93e   : > { %872 = vrcp.f32 %v588_v9 }
 0x948   : > { %v873_v10 = vpop.eup %872 }
 0x949   : > { %v592_v13 = vmul.f32 %v873_v10, %v497_v61 }
 0x9ac   : > { %v595_v11 = vpop.permute.xlu1 %594 }
 0x9ad   : > { %v597_v12 = vmul.f32 %v873_v10, %v595_v11 }
 0x9af   : > { %599 = vrot.lane.b32.xlu0 %v597_v12, %s905_s30 }
 0xa21   : > { %v600_v14 = vpop.permute.xlu0 %599 }
 0xa22   : > { %v602_v15 = vadd.f32 %v600_v14, %v592_v13 }
 0xa24   : > { %874 = vtanh.f32 %v602_v15 }
 0xa2e   : > { %v875_v16 = vpop.eup %874 }
 0xa2f   : > { %605 = vrot.lane.b32.xlu1 %v875_v16, %s904_s29 }
 0xa33   : > { %617 = vrot.lane.b32.xlu1 %v602_v15, %s906_s3 }
 0xaa1   : > { %v606_v17 = vpop.permute.xlu1 %605 }
 0xaa2   : > { %v608_v18 = vmul.f32 %v873_v10, %v606_v17 }
 0xaa4   : > { %610 = vrot.lane.b32.xlu0 %v608_v18, %s905_s30 }
 0xaa5   : > { %v618_v19 = vpop.permute.xlu1 %617 }
 0xaa6   : > { %620 = vst.msk [vmem:[#allocation3] sm:$0xff] %vm192_vm2, %v618_v19 }
 0xb16   : > { %v611_v20 = vpop.permute.xlu0 %610 }
 0xb17   : > { %722 = vst.msk [vmem:[%s948_s20 + $0x18] sm:$0xff] %vm192_vm2, %v611_v20  ;;  %615 = vst.msk [vmem:[#allocation2] sm:$0xff] %vm192_vm2, %v611_v20 }
 0xb18 PF: > { %s12_s11 = sadd.s32 1, %s898_s11   ;;  %s1013_s9 = smov %s894_s10 }
 0xb19   : > { %p9_p6 = scmp.ge.s32.totalorder %s12_s11, 4   ;;  %s1014_s10 = smov %s1016_s12 }
 0xb1b   :  { %11 = sbr.rel (!%p9_p6) target bundleno = 2 (0x2), region = 68 }

// kernel: encoder_forward.6
= control target key start
LH: loop header
LB: loop body
LE: loop exit
PB: predicated region body
PF: predicated region fallthrough
CT: control target
= control target key end

     0   :  { %vm33_vm0 = vcmask 261120   ;;  %s319_s1 = inlined_call_operand.vmem [shape: f32[32,128], index: 1, kind: input, shape index: {}]   ;;  %s320_s0 = inlined_call_operand.vmem [shape: f32[64,32], index: 0, kind: input, shape index: {}]   ;;  %s321_s2 = inlined_call_operand.vmem [shape: f32[1,128], index: 2, kind: input, shape index: {}]   ;;  %s322_s3 = inlined_call_operand.vmem [shape: f32[64,128], index: 3, kind: output, shape index: {}]  }
   0x1   :  { %v22_v0 = vld [vmem:[%s319_s1] sm:$0xff]  ;;  %v23_v1 = vld [vmem:[%s319_s1 + $0x8] sm:$0xff]  ;;  %v24_v2 = vld [vmem:[%s319_s1 + $0x10] sm:$0xff] }
   0x2   :  { %v216_v3 = vpack.c.bf16 %v23_v1, %v22_v0  ;;  %v25_v4 = vld [vmem:[%s319_s1 + $0x18] sm:$0xff]  ;;  %v14_v5 = vld [vmem:[%s320_s0] sm:$0xff]  ;;  %v15_v8 = vld [vmem:[%s320_s0 + $0x8] sm:$0xff] }
   0x3   :  { %v18_v6 = vld [vmem:[%s320_s0 + $0x20] sm:$0xff]  ;;  %v220_v7 = vpack.c.bf16 %v25_v4, %v24_v2  ;;  %204 = vmatprep.mubr.msk.f32.mxu0 %vm33_vm0, %v14_v5  ;;  %v19_v9 = vld [vmem:[%s320_s0 + $0x28] sm:$0xff]  ;;  %v16_v10 = vld [vmem:[%s320_s0 + $0x10] sm:$0xff] }
   0x4   :  { %210 = vmatprep.mubr.msk.f32.mxu1 %vm33_vm0, %v18_v6  ;;  %217 = vmatprep.subr.bf16.mxu0 %v216_v3  ;;  %v20_v11 = vld [vmem:[%s320_s0 + $0x30] sm:$0xff]  ;;  %v17_v12 = vld [vmem:[%s320_s0 + $0x18] sm:$0xff]  ;;  %v175_v14 = vld [vmem:[%s321_s2] ss:$0 sm:$0xff] }
   0x5   :  { %224 = vmatprep.subr.bf16.mxu1 %v216_v3  ;;  %219 = vmatpush3.bf16.msra.mxu0 %v216_v3  ;;  %v21_v13 = vld [vmem:[%s320_s0 + $0x38] sm:$0xff] }
   0x6   :  { %226 = vmatpush3.bf16.msra.mxu1 %v216_v3  ;;  %221 = vmatprep.subr.bf16.mxu0 %v220_v7 }
   0x7   :  { %225 = vmatprep.subr.bf16.mxu1 %v220_v7 }
   0x9   :  { %223 = vmatpush3.bf16.msra.mxu0 %v220_v7 }
   0xa   :  { %227 = vmatpush3.bf16.msra.mxu1 %v220_v7 }
   0xc   :  { %205 = vmatmul.mubr.msk.f32.vlgmr.msra.gmra.mrb[0].mxu0 %vm33_vm0, %v15_v8 }
   0xd   :  { %211 = vmatmul.mubr.msk.f32.vlgmr.msra.gmra.mrb[0].mxu1 %vm33_vm0, %v19_v9  ;;  %207 = vmatprep.mubr.msk.f32.mxu0 %vm33_vm0, %v16_v10 }
   0xe   :  { %213 = vmatprep.mubr.msk.f32.mxu1 %vm33_vm0, %v20_v11 }
  0x10   :  { %208 = vmatmul.mubr.msk.f32.gmra.mrb[2].mxu0 %vm33_vm0, %v17_v12 }
  0x11   :  { %214 = vmatmul.mubr.msk.f32.gmra.mrb[2].mxu1 %vm33_vm0, %v21_v13 }
  0xdf   :  { %v206_v15 = vpop.f32.mrb[0].mxu0 }
  0xe0   :  { %v212_v16 = vpop.f32.mrb[0].mxu1  ;;  %v130_v17 = vadd.f32 %v206_v15, %v175_v14  ;;  %v124_v19 = vpop.f32.mrb[1].mxu0 }
  0xe1   :  { %v150_v18 = vadd.f32 %v212_v16, %v175_v14  ;;  %v144_v20 = vpop.f32.mrb[1].mxu1  ;;  %v125_v21 = vadd.f32 %v175_v14, %v124_v19 }
  0xe2   :  { %v145_v22 = vadd.f32 %v175_v14, %v144_v20  ;;  %164 = vst [vmem:[%s322_s3 + $0x8] sm:$0xff] %v130_v17 }
  0xe3   :  { %168 = vst [vmem:[%s322_s3 + $0x28] sm:$0xff] %v150_v18  ;;  %163 = vst [vmem:[%s322_s3] sm:$0xff] %v125_v21  ;;  %v209_v23 = vpop.f32.mrb[2].mxu0 }
  0xe4   :  { %167 = vst [vmem:[%s322_s3 + $0x20] sm:$0xff] %v145_v22  ;;  %v215_v24 = vpop.f32.mrb[2].mxu1  ;;  %v140_v25 = vadd.f32 %v209_v23, %v175_v14  ;;  %v134_v27 = vpop.f32.mrb[3].mxu0 }
  0xe5   :  { %v160_v26 = vadd.f32 %v215_v24, %v175_v14  ;;  %v154_v28 = vpop.f32.mrb[3].mxu1  ;;  %v135_v29 = vadd.f32 %v175_v14, %v134_v27 }
  0xe6   :  { %v155_v30 = vadd.f32 %v175_v14, %v154_v28  ;;  %166 = vst [vmem:[%s322_s3 + $0x18] sm:$0xff] %v140_v25 }
  0xe7   :  { %170 = vst [vmem:[%s322_s3 + $0x38] sm:$0xff] %v160_v26  ;;  %165 = vst [vmem:[%s322_s3 + $0x10] sm:$0xff] %v135_v29 }
  0xe8   :  { %169 = vst [vmem:[%s322_s3 + $0x30] sm:$0xff] %v155_v30 }

// kernel: encoder_forward.7
= control target key start
LH: loop header
LB: loop body
LE: loop exit
PB: predicated region body
PF: predicated region fallthrough
CT: control target
= control target key end

     0   :  { %s1066_s15 = smov 0   ;;  %s1068_s16 = smov 0   ;;  %s1168_s0 = inlined_call_operand.vmem [shape: f32[8,8,128], index: 0, kind: input, shape index: {}]   ;;  %s1169_s1 = inlined_call_operand.vmem [shape: f32[32,128], index: 1, kind: input, shape index: {}]   ;;  %s1170_s2 = inlined_call_operand.vmem [shape: f32[32,8], index: 2, kind: input, shape index: {}]   ;;  %s1171_s3 = inlined_call_operand.vmem [shape: f32[1,8], index: 3, kind: input, shape index: {}]   ;;  %s1172_s4 = inlined_call_operand.vmem [shape: f32[8,8], index: 4, kind: output, shape index: {}]  }
   0x1   :  { %s1070_s17 = smov 0  }
   0x2 LB: > { %s23_s18 = sadd.s32 1, %s1025_s16  ;;  %p810_p0 = scmp.ge.s32.totalorder %s1029_s17, 1  ;;  %s1029_s17 = sphi %s1070_s17, %s14_s17   ;;  %s1025_s16 = sphi %s1068_s16, %s1174_s16   ;;  %s1021_s15 = sphi %s1066_s15, %s1173_s15  }
   0x3   : > { %p24_p1 = scmp.ge.s32.totalorder %s23_s18, 2  ;;  %p180_p2 = scmp.lt.s32.totalorder %s1029_s17, 3 }
   0x5   : > { %s1176_s18 = smov (%p24_p1, %s23_s18), 0  ;;  %p181_p3 = pnand %p810_p0, %p180_p2 }
   0x6   : > { %s811_s19 = sshll.u32 (!%p181_p3), %s1021_s15, 2  ;;  %p813_p5 = scmp.ne.s32.totalorder (!%p181_p3), %s1021_s15, 0 }
   0x7   : > { %184 = sbr.rel (%p181_p3) target bundleno = 3054 (0xbee), region = 36  ;;  %p209_p4 = scmp.lt.s32.totalorder (!%p181_p3), %s811_s19, 7 }
   0xe   : > { %s1178_s19 = smov (!%p209_p4, %s811_s19), 7  ;;  %224 = sbr.rel (%p813_p5) target bundleno = 21 (0x15), region = 40 }
   0xf   : > { %s812_s20 = sshll.u32 %s1178_s19, 3  ;;  %vm225_vm0 = vcmask (!%p813_p5), 261120   ;;  %vm228_vm1 = vcmask (!%p813_p5), 64512   ;;  %v1031_v0 = vmov (!%p813_p5), 0.0  }
  0x10   : > { %s1090_s23 = scalar_lea.vmem %s1168_s0, %s812_s20  ;;  %226 = vst.msk [vmem:[#allocation2] sm:$0xff] (!%p813_p5), %vm225_vm0, %v1031_v0  ;;  %227 = vst.msk [vmem:[#allocation3] sm:$0xff] (!%p813_p5), %vm225_vm0, %v1031_v0 }
  0x11   : > { %229 = vst.msk [vmem:[%s1172_s4] sm:$0xff] (!%p813_p5), %vm228_vm1, %v1031_v0 }
  0x15 PF: > { %v230_v1 = vld [vmem:[%s1169_s1] sm:$0xff]  ;;  %v231_v2 = vld [vmem:[%s1169_s1 + $0x8] sm:$0xff]  ;;  %v232_v3 = vld [vmem:[%s1169_s1 + $0x10] sm:$0xff]  ;;  %v1032_v4 = vmov 0.0|0.0   ;;  %vm1033_vm2 = vmmov 0   ;;  %v1034_v7 = vmov 0.0  }
  0x16   : > { %911 = vmatprep.subr.bf16.mxu0 %v1032_v4  ;;  %v912_v5 = vpack.c.bf16 %v231_v2, %v230_v1  ;;  %v233_v6 = vld [vmem:[%s1169_s1 + $0x18] sm:$0xff]  ;;  %864 = vmatprep.mubr.msk.f32.mxu0 %vm1033_vm2, %v1034_v7  ;;  %vm237_vm3 = vcmask 261120   ;;  %v236_v10 = vld [vmem:[%s1090_s23] sm:$0xff]  ;;  %s1035_s8 = smov 64   ;;  %s1036_s9 = smov 32   ;;  %v816_v30 = vld [vmem:[%s1090_s23 + $0x8] sm:$0xff] }
  0x17   : > { %917 = vmatprep.subr.bf16.mxu1 %v1032_v4  ;;  %875 = vmatprep.mubr.msk.f32.mxu1 %vm1033_vm2, %v1034_v7  ;;  %v915_v8 = vpack.c.bf16 %v233_v6, %v232_v3  ;;  %v234_v9 = vld [vmem:[#allocation2] sm:$0xff]  ;;  %v235_v15 = vld [vmem:[#allocation3] sm:$0xff]  ;;  %v819_v48 = vld [vmem:[%s1090_s23 + $0x10] sm:$0xff]  ;;  %s1037_s10 = smov 96   ;;  %p825_p6 = scmp.ne.s32.totalorder %s1021_s15, 1 }
  0x18   : > { %913 = vmatpush3.bf16.msra.mxu0 %v912_v5  ;;  %919 = vmatpush3.bf16.msra.mxu1 %v912_v5  ;;  %v822_v2 = vld [vmem:[%s1090_s23 + $0x18] sm:$0xff]  ;;  %vm1039_vm4 = vmmov (!%p825_p6), 0   ;;  %vm743_vm5 = vcmask (!%p825_p6), 64512  }
  0x19   : > { %914 = vmatprep.subr.bf16.mxu0 %v1032_v4  ;;  %920 = vmatprep.subr.bf16.mxu1 %v1032_v4 }
  0x1c   : > { %916 = vmatpush3.bf16.msra.mxu0 %v915_v8  ;;  %922 = vmatpush3.bf16.msra.mxu1 %v915_v8 }
  0x1d   : > { %923 = vmatprep.subr.bf16.mxu0 %v1032_v4  ;;  %929 = vmatprep.subr.bf16.mxu1 %v1032_v4 }
  0x1f   : > { %865 = vmatmul.mubr.msk.f32.vlgmr.msra.gmra.mrb[0].mxu0 %vm237_vm3, %v234_v9 }
  0x20   : > { %925 = vmatpush3.bf16.msra.mxu0 %v912_v5  ;;  %886 = vmatprep.mubr.msk.f32.mxu0 %vm1033_vm2, %v1034_v7 }
  0x21   : > { %926 = vmatprep.subr.bf16.mxu0 %v1032_v4 }
  0x24   : > { %928 = vmatpush3.bf16.msra.mxu0 %v915_v8 }
  0xf2   : > { %v307_v11 = vpop.f32.mrb[0].mxu0 }
  0xf3   : > { %v311_v12 = vadd.f32 %v307_v11, %v236_v10  ;;  %v866_v13 = vpop.f32.mrb[1].mxu0 }
  0xf5   : > { %975 = vtanh.f32 %v311_v12  ;;  %v815_v16 = vmul.f32 -1.442695, %v311_v12 }
  0xf7   : > { %977 = vpow2.f32 %v815_v16 }
  0xff   : > { %v976_v14 = vpop.eup %975 }
 0x100   : > { %325 = vrot.lane.b32.xlu0 %v976_v14, %s1035_s8 }
 0x101   : > { %v978_v17 = vpop.eup %977 }
 0x102   : > { %v315_v18 = vadd.f32 1.0, %v978_v17 }
 0x104   : > { %320 = vrot.lane.b32.xlu0 %v235_v15, %s1036_s9  ;;  %979 = vrcp.f32 %v315_v18 }
 0x10e   : > { %v980_v19 = vpop.eup %979 }
 0x172   : > { %v326_v20 = vpop.permute.xlu0 %325 }
 0x173   : > { %v328_v21 = vmul.f32 %v980_v19, %v326_v20 }
 0x175   : > { %330 = vrot.lane.b32.xlu1 %v328_v21, %s1036_s9  ;;  %v660_v21 = vld [vmem:[%s1170_s2] sm:$0xff] (!%p825_p6) }
 0x176   : > { %v321_v22 = vpop.permute.xlu0 %320 }
 0x177   : > { %v323_v23 = vmul.f32 %v980_v19, %v321_v22  ;;  %v661_v22 = vld [vmem:[%s1170_s2 + $0x8] sm:$0xff] (!%p825_p6) }
 0x1e7   : > { %v331_v24 = vpop.permute.xlu1 %330 }
 0x1e8   : > { %v333_v25 = vadd.f32 %v331_v24, %v323_v23  ;;  %v662_v23 = vld [vmem:[%s1170_s2 + $0x10] sm:$0xff] (!%p825_p6)  ;;  %v1038_v24 = vmov (!%p825_p6), 0.0|0.0  }
 0x1e9   : > { %935 = vmatprep.subr.bf16.mxu0 (!%p825_p6), %v1038_v24 }
 0x1ea   : > { %981 = vtanh.f32 %v333_v25 }
 0x1f4   : > { %v982_v26 = vpop.eup %981 }
 0x1f5   : > { %336 = vrot.lane.b32.xlu1 %v982_v26, %s1035_s8  ;;  %v663_v26 = vld [vmem:[%s1170_s2 + $0x18] sm:$0xff] (!%p825_p6) }
 0x267   : > { %v337_v27 = vpop.permute.xlu1 %336 }
 0x268   : > { %v339_v28 = vmul.f32 %v980_v19, %v337_v27  ;;  %v1040_v27 = vmov (!%p825_p6), 0.0  }
 0x26a   : > { %343 = vrot.lane.b32.xlu0 %v339_v28, %s1036_s9  ;;  %v939_v28 = vpack.c.bf16 (!%p825_p6), %v663_v26, %v662_v23 }
 0x2dc   : > { %v344_v29 = vpop.permute.xlu0 %343 }
 0x2dd   : > { %876 = vmatmul.mubr.msk.f32.vlgmr.msra.gmra.mrb[0].mxu1 %vm237_vm3, %v344_v29  ;;  %v826_v29 = vld [vmem:[%s1171_s3] ss:$0 sm:$0xff] (!%p825_p6) }
 0x2de   : > { %931 = vmatpush3.bf16.msra.mxu1 %v912_v5  ;;  %897 = vmatprep.mubr.msk.f32.mxu1 %vm1033_vm2, %v1034_v7 }
 0x2df   : > { %932 = vmatprep.subr.bf16.mxu1 %v1032_v4 }
 0x2e2   : > { %934 = vmatpush3.bf16.msra.mxu1 %v915_v8 }
 0x3b0   : > { %v413_v31 = vpop.f32.mrb[0].mxu1 }
 0x3b1   : > { %v417_v32 = vadd.f32 %v816_v30, %v413_v31  ;;  %v877_v33 = vpop.f32.mrb[1].mxu1 }
 0x3b3   : > { %983 = vtanh.f32 %v417_v32  ;;  %v818_v35 = vmul.f32 -1.442695, %v417_v32 }
 0x3b5   : > { %985 = vpow2.f32 %v818_v35 }
 0x3bd   : > { %v984_v34 = vpop.eup %983 }
 0x3be   : > { %427 = vrot.lane.b32.xlu1 %v984_v34, %s1035_s8 }
 0x3bf   : > { %v986_v36 = vpop.eup %985 }
 0x3c0   : > { %v421_v37 = vadd.f32 1.0, %v986_v36 }
 0x3c2   : > { %987 = vrcp.f32 %v421_v37 }
 0x3cc   : > { %v988_v38 = vpop.eup %987 }
 0x3cd   : > { %v425_v41 = vmul.f32 %v988_v38, %v333_v25  ;;  %v936_v25 = vpack.c.bf16 (!%p825_p6), %v661_v22, %v660_v21 }
 0x430   : > { %v428_v39 = vpop.permute.xlu1 %427 }
 0x431   : > { %v430_v40 = vmul.f32 %v988_v38, %v428_v39 }
 0x433   : > { %432 = vrot.lane.b32.xlu0 %v430_v40, %s1036_s9 }
 0x4a5   : > { %v433_v42 = vpop.permute.xlu0 %432 }
 0x4a6   : > { %v435_v43 = vadd.f32 %v433_v42, %v425_v41 }
 0x4a8   : > { %989 = vtanh.f32 %v435_v43 }
 0x4b2   : > { %v990_v44 = vpop.eup %989 }
 0x4b3   : > { %438 = vrot.lane.b32.xlu1 %v990_v44, %s1035_s8 }
 0x525   : > { %v439_v45 = vpop.permute.xlu1 %438 }
 0x526   : > { %v441_v46 = vmul.f32 %v988_v38, %v439_v45 }
 0x528   : > { %445 = vrot.lane.b32.xlu0 %v441_v46, %s1036_s9 }
 0x59a   : > { %v446_v47 = vpop.permute.xlu0 %445 }
 0x59b   : > { %887 = vmatmul.mubr.msk.f32.vlgmr.msra.gmra.mrb[2].mxu0 %vm237_vm3, %v446_v47 }
 0x59c   : > { %908 = vmatprep.mubr.msk.f32.mxu0 (!%p825_p6), %vm1039_vm4, %v1040_v27  ;;  %937 = vmatpush3.bf16.msra.mxu0 (!%p825_p6), %v936_v25 }
 0x59d   : > { %938 = vmatprep.subr.bf16.mxu0 (!%p825_p6), %v1038_v24 }
 0x5a0   : > { %940 = vmatpush3.bf16.msra.mxu0 (!%p825_p6), %v939_v28 }
 0x66e   : > { %v515_v49 = vpop.f32.mrb[2].mxu0 }
 0x66f   : > { %v519_v50 = vadd.f32 %v819_v48, %v515_v49  ;;  %v888_v51 = vpop.f32.mrb[3].mxu0 }
 0x671   : > { %991 = vtanh.f32 %v519_v50  ;;  %v821_v53 = vmul.f32 -1.442695, %v519_v50 }
 0x673   : > { %993 = vpow2.f32 %v821_v53 }
 0x67b   : > { %v992_v52 = vpop.eup %991 }
 0x67c   : > { %529 = vrot.lane.b32.xlu1 %v992_v52, %s1035_s8 }
 0x67d   : > { %v994_v54 = vpop.eup %993 }
 0x67e   : > { %v523_v55 = vadd.f32 1.0, %v994_v54 }
 0x680   : > { %995 = vrcp.f32 %v523_v55 }
 0x68a   : > { %v996_v56 = vpop.eup %995 }
 0x68b   : > { %v527_v59 = vmul.f32 %v996_v56, %v435_v43 }
 0x6ee   : > { %v530_v57 = vpop.permute.xlu1 %529 }
 0x6ef   : > { %v532_v58 = vmul.f32 %v996_v56, %v530_v57 }
 0x6f1   : > { %534 = vrot.lane.b32.xlu0 %v532_v58, %s1036_s9 }
 0x763   : > { %v535_v60 = vpop.permute.xlu0 %534 }
 0x764   : > { %v537_v61 = vadd.f32 %v535_v60, %v527_v59 }
 0x766   : > { %997 = vtanh.f32 %v537_v61 }
 0x770   : > { %v998_v62 = vpop.eup %997 }
 0x771   : > { %540 = vrot.lane.b32.xlu1 %v998_v62, %s1035_s8 }
 0x7e3   : > { %v541_v63 = vpop.permute.xlu1 %540 }
 0x7e4   : > { %v543_v0 = vmul.f32 %v996_v56, %v541_v63 }
 0x7e6   : > { %547 = vrot.lane.b32.xlu0 %v543_v0, %s1036_s9 }
 0x858   : > { %v548_v1 = vpop.permute.xlu0 %547 }
 0x859   : > { %898 = vmatmul.mubr.msk.f32.vlgmr.msra.gmra.mrb[2].mxu1 %vm237_vm3, %v548_v1 }
 0x92c   : > { %v617_v3 = vpop.f32.mrb[2].mxu1 }
 0x92d   : > { %v621_v4 = vadd.f32 %v822_v2, %v617_v3  ;;  %v899_v5 = vpop.f32.mrb[3].mxu1 }
 0x92f   : > { %999 = vtanh.f32 %v621_v4  ;;  %v824_v7 = vmul.f32 -1.442695, %v621_v4 }
 0x931   : > { %1001 = vpow2.f32 %v824_v7 }
 0x939   : > { %v1000_v6 = vpop.eup %999 }
 0x93a   : > { %631 = vrot.lane.b32.xlu1 %v1000_v6, %s1035_s8 }
 0x93b   : > { %v1002_v8 = vpop.eup %1001 }
 0x93c   : > { %v625_v9 = vadd.f32 1.0, %v1002_v8 }
 0x93e   : > { %1003 = vrcp.f32 %v625_v9 }
 0x948   : > { %v1004_v10 = vpop.eup %1003 }
 0x949   : > { %v629_v13 = vmul.f32 %v1004_v10, %v537_v61 }
 0x9ac   : > { %v632_v11 = vpop.permute.xlu1 %631 }
 0x9ad   : > { %v634_v12 = vmul.f32 %v1004_v10, %v632_v11 }
 0x9af   : > { %636 = vrot.lane.b32.xlu0 %v634_v12, %s1036_s9 }
 0xa21   : > { %v637_v14 = vpop.permute.xlu0 %636 }
 0xa22   : > { %v639_v15 = vadd.f32 %v637_v14, %v629_v13 }
 0xa24   : > { %1005 = vtanh.f32 %v639_v15 }
 0xa2e   : > { %v1006_v16 = vpop.eup %1005 }
 0xa2f   : > { %642 = vrot.lane.b32.xlu1 %v1006_v16, %s1035_s8 }
 0xa33   : > { %652 = vrot.lane.b32.xlu1 %v639_v15, %s1037_s10 }
 0xaa1   : > { %v643_v17 = vpop.permute.xlu1 %642 }
 0xaa2   : > { %v645_v18 = vmul.f32 %v1004_v10, %v643_v17 }
 0xaa4   : > { %647 = vrot.lane.b32.xlu0 %v645_v18, %s1036_s9 }
 0xaa5   : > { %v653_v19 = vpop.permute.xlu1 %652 }
 0xaa6   : > { %655 = vst.msk [vmem:[#allocation3] sm:$0xff] %vm237_vm3, %v653_v19 }
 0xb11   : > { %659 = sbr.rel (%p825_p6) target bundleno = 3054 (0xbee), region = 44 }
 0xb16   : > { %v648_v20 = vpop.permute.xlu0 %647 }
 0xb17   : > { %650 = vst.msk [vmem:[#allocation2] sm:$0xff] %vm237_vm3, %v648_v20  ;;  %909 = vmatmul.mubr.msk.f32.vlgmr.msra.gmra.mrb[0].mxu0 (!%p825_p6), %vm237_vm3, %v648_v20 }
 0xbea   : > { %v739_v30 = vpop.f32.mrb[0].mxu0 }
 0xbeb   : > { %v740_v31 = vadd.f32 %v826_v29, %v739_v30  ;;  %v910_v32 = vpop.f32.mrb[1].mxu0 }
 0xbed   : > { %744 = vst.msk [vmem:[%s1172_s4] sm:$0xff] %vm743_vm5, %v740_v31 }
 0xbee PF: > { %s14_s17 = sadd.s32 1, %s1029_s17   ;;  %s1173_s15 = smov %s1025_s16 }
 0xbef   : > { %p11_p7 = scmp.ge.s32.totalorder %s14_s17, 4   ;;  %s1174_s16 = smov %s1176_s18 }
 0xbf1   :  { %13 = sbr.rel (!%p11_p7) target bundleno = 2 (0x2), region = 77 }

</bundles_post_ra>
